<compile_context>
chip_gen: v6e
topology: v6e:2x2x1
jax: 0.10.0
libtpu: 0.0.40
codegen_flags: <defaults>
</compile_context>

<pallas_src>
import jax
import jax.numpy as jnp
from jax.experimental import pallas as pl
from jax.experimental.pallas import tpu as pltpu

BN_EPS = 1e-5

_VMEM_BUDGET = 24 * 1024 * 1024   # conservative tile budget (safe on v7x 64 MiB)
_VMEM_LIMIT = 32 * 1024 * 1024    # scoped-VMEM limit requested from Mosaic


def proj_head_kernel(x_ref, w_ref, gb_ref, o_ref):
    # x_ref:  (N, H)   full input batch, f32 (same block on every grid step)
    # w_ref:  (TH, H)  row block of the PyTorch-layout [out, in] linear weight
    # gb_ref: (2, TH)  row 0 = BN gamma, row 1 = BN beta
    # o_ref:  (N, TH)  output channel slice
    n = x_ref.shape[0]
    inv_n = jnp.float32(1.0 / n)

    # Linear (bias omitted: it cancels exactly under training-mode BatchNorm).
    # bf16 operands + f32 MXU accumulation; the contraction runs over the
    # shared 'in' dim so W keeps its native [out, in] layout (no host w.T).
    y = jax.lax.dot_general(
        x_ref[...].astype(jnp.bfloat16),
        w_ref[...].astype(jnp.bfloat16),
        dimension_numbers=(((1,), (1,)), ((), ())),
        preferred_element_type=jnp.float32)               # [N, TH] f32

    # BatchNorm1d training-mode batch stats (biased variance), all in f32.
    # Two independent reductions -> shorter critical path than mean->center->var.
    mean = jnp.sum(y, axis=0, keepdims=True) * inv_n       # E[y]      [1, TH]
    msq = jnp.sum(y * y, axis=0, keepdims=True) * inv_n    # E[y^2]    [1, TH]
    var = msq - mean * mean
    inv_std = jax.lax.rsqrt(var + BN_EPS)                  # EUP rsqrt

    gamma = gb_ref[0:1, :]
    beta = gb_ref[1:2, :]
    scale = inv_std * gamma                                # [1, TH]
    shift = beta - mean * scale                            # [1, TH]
    o_ref[...] = (y * scale + shift).astype(o_ref.dtype)   # one broadcast FMA


def _has_two_tensorcores():
    """True on chips with 2 TensorCores (v7x) -> keep >= 2 parallel grid steps."""
    try:
        kind = jax.devices()[0].device_kind.lower()
    except Exception:
        return False
    return ("v7" in kind) or ("7x" in kind)


def _pick_channel_tile(N, H, two_tc):
    """Largest lane-dense channel tile TH (multiple of 128, divides H) that fits
    the VMEM budget; on 2-TC chips prefer TH giving >= 2 grid steps."""
    if H % 128 != 0:
        return H   # full-dim fallback: legal block, masked stores on last lanes

    def fits(th):
        x_b = N * H * 4            # x: single pipeline buffer (constant block)
        w_b = 2 * th * H * 4       # weight row block, double-buffered
        o_b = 2 * N * th * 4       # output tile, double-buffered
        gb_b = 2 * 2 * th * 4      # packed gamma/beta, double-buffered
        return (x_b + w_b + o_b + gb_b) <= _VMEM_BUDGET

    cands = [t for t in range(H, 0, -128) if H % t == 0]   # descending
    if two_tc:
        multi = [t for t in cands if H // t >= 2 and fits(t)]
        if multi:
            return multi[0]
    for t in cands:
        if fits(t):
            return t
    # TODO(synk): for very large N (whole batch no longer VMEM-resident) switch
    # to an N-tiled two-phase kernel (accumulate per-channel sum/sumsq with an
    # 'arbitrary' batch axis, then normalize).  Not needed at demo sizes.
    return 128


def proj_head(x, w, gamma, beta):
    """Proj_head forward (training mode).

    x: [N, H] f32; w: PyTorch-layout [out, in] f32; gamma/beta: [H] f32.
    The linear bias is intentionally not an input: under training-mode BN it
    has no effect on the returned tensor (it cancels in y - mean)."""
    N, H = x.shape
    TH = _pick_channel_tile(N, H, _has_two_tensorcores())
    steps = H // TH

    gb = jnp.stack([gamma, beta], axis=0)                  # (2, H)

    w_spec = pl.BlockSpec((TH, H), lambda j: (j, 0))       # W row block [out,in]
    gb_spec = pl.BlockSpec((2, TH), lambda j: (0, j))      # packed gamma/beta
    out_spec = pl.BlockSpec((N, TH), lambda j: (0, j))     # lane-dense output

    def call(x_spec):
        return pl.pallas_call(
            proj_head_kernel,
            out_shape=jax.ShapeDtypeStruct((N, H), jnp.float32),
            grid=(steps,),
            in_specs=[x_spec, w_spec, gb_spec],
            out_specs=out_spec,
            compiler_params=pltpu.CompilerParams(
                dimension_semantics=("parallel",),
                vmem_limit_bytes=_VMEM_LIMIT),
        )(x, w, gb)

    try:
        # x's block index is constant across the grid -> one pipeline buffer is
        # enough; halves x's VMEM footprint and frees room for a larger TH.
        return call(pl.BlockSpec((N, H), lambda j: (0, 0),
                                 pipeline_mode=pl.Buffered(1)))
    except Exception:
        # Fallback for jax builds without pipeline_mode/Buffered(1) support.
        return call(pl.BlockSpec((N, H), lambda j: (0, 0)))


def reference(x, w, b, gamma, beta, matmul_dtype=jnp.float32):
    """Pure-JAX Proj_head forward (Linear + training-mode BatchNorm1d)."""
    y = jax.lax.dot_general(
        x.astype(matmul_dtype), w.astype(matmul_dtype),
        dimension_numbers=(((1,), (1,)), ((), ())),
        preferred_element_type=jnp.float32) + b            # bias cancels in BN
    mean = jnp.mean(y, axis=0, keepdims=True)
    var = jnp.mean((y - mean) ** 2, axis=0, keepdims=True)  # biased variance
    return (y - mean) / jnp.sqrt(var + BN_EPS) * gamma + beta


# TODO(synk): BatchNorm1d's running_mean/running_var update (a training-time
# side effect, not part of the returned tensor) and the eval-mode path using
# running statistics are not implemented here.

if __name__ == "__main__":
    N, H = 128, 256   # small batch / hidden; H multiple of 128 -> lane-dense

    key = jax.random.PRNGKey(0)
    ks = jax.random.split(key, 5)

    x = jax.random.normal(ks[0], (N, H), jnp.float32)

    # nn.Linear default init: U(-1/sqrt(in), 1/sqrt(in)) for W and b.
    bound = 1.0 / (H ** 0.5)
    w = jax.random.uniform(ks[1], (H, H), jnp.float32, -bound, bound)   # [out, in]
    b = jax.random.uniform(ks[2], (H,), jnp.float32, -bound, bound)
    # BN affine params (default init gamma=1, beta=0; perturb to exercise them).
    gamma = 1.0 + 0.1 * jax.random.normal(ks[3], (H,), jnp.float32)
    beta = 0.1 * jax.random.normal(ks[4], (H,), jnp.float32)

    out = jax.block_until_ready(proj_head(x, w, gamma, beta))
    assert out.shape == (N, H)

    # Tight check vs. a reference using the same bf16-operand matmul precision.
    ref_bf16 = reference(x, w, b, gamma, beta, matmul_dtype=jnp.bfloat16)
    err_bf16 = float(jnp.max(jnp.abs(out - ref_bf16)))
    assert jnp.allclose(out, ref_bf16, atol=2e-4, rtol=2e-4), err_bf16

    # Looser sanity check vs. the full-f32 module math (bf16 matmul precision).
    ref_f32 = reference(x, w, b, gamma, beta, matmul_dtype=jnp.float32)
    err_f32 = float(jnp.max(jnp.abs(out - ref_f32)))
    assert jnp.allclose(out, ref_f32, atol=3e-2, rtol=3e-2), err_f32

    print("KERNEL_OK")
</pallas_src>

<mosaic_0001>
module attributes {stable_mosaic.version = 11 : i64} {
  func.func @proj_head_kernel(%arg0: i32, %arg1: memref<128x256xf32, #tpu.memory_space<vmem>>, %arg2: memref<256x256xf32, #tpu.memory_space<vmem>>, %arg3: memref<2x256xf32, #tpu.memory_space<vmem>>, %arg4: memref<128x256xf32, #tpu.memory_space<vmem>>) attributes {dimension_semantics = [#tpu.dimension_semantics<parallel>], iteration_bounds = array<i64: 1>, scalar_prefetch = 0 : i64, scratch_operands = 0 : i64, tpu.core_type = #tpu.core_type<tc>, window_params = [{pipeline_mode = #tpu.pipeline_mode<synchronous>, transform_indices = @transform_0, window_bounds = array<i64: 128, 256>}, {transform_indices = @transform_1, window_bounds = array<i64: 256, 256>}, {transform_indices = @transform_2, window_bounds = array<i64: 2, 256>}, {transform_indices = @transform_3, window_bounds = array<i64: 128, 256>}]} {
    %c0 = arith.constant 0 : index
    %c0_0 = arith.constant 0 : index
    %0 = vector.load %arg1[%c0, %c0_0] : memref<128x256xf32, #tpu.memory_space<vmem>>, vector<128x256xf32>
    %1 = arith.truncf %0 : vector<128x256xf32> to vector<128x256xbf16>
    %c0_1 = arith.constant 0 : index
    %c0_2 = arith.constant 0 : index
    %2 = vector.load %arg2[%c0_1, %c0_2] : memref<256x256xf32, #tpu.memory_space<vmem>>, vector<256x256xf32>
    %3 = arith.truncf %2 : vector<256x256xf32> to vector<256x256xbf16>
    %cst = arith.constant dense<0.000000e+00> : vector<128x256xf32>
    %4 = tpu.matmul %1, %3, %cst {dimension_numbers = #tpu.dot_dimension_numbers<[1], [1], [0], [0], [0, 0, 1, 0], [], []>} : vector<128x256xbf16>, vector<256x256xbf16>, vector<128x256xf32> -> vector<128x256xf32>
    %cst_3 = arith.constant dense<0.000000e+00> : vector<256xf32>
    %5 = vector.multi_reduction <add>, %4, %cst_3 [0] : vector<128x256xf32> to vector<256xf32>
    %6 = vector.shape_cast %5 : vector<256xf32> to vector<1x256xf32>
    %cst_4 = arith.constant 7.812500e-03 : f32
    %7 = vector.broadcast %cst_4 : f32 to vector<1x256xf32>
    %8 = arith.mulf %6, %7 : vector<1x256xf32>
    %9 = arith.mulf %4, %4 : vector<128x256xf32>
    %cst_5 = arith.constant dense<0.000000e+00> : vector<256xf32>
    %10 = vector.multi_reduction <add>, %9, %cst_5 [0] : vector<128x256xf32> to vector<256xf32>
    %11 = vector.shape_cast %10 : vector<256xf32> to vector<1x256xf32>
    %cst_6 = arith.constant 7.812500e-03 : f32
    %12 = vector.broadcast %cst_6 : f32 to vector<1x256xf32>
    %13 = arith.mulf %11, %12 : vector<1x256xf32>
    %14 = arith.mulf %8, %8 : vector<1x256xf32>
    %15 = arith.subf %13, %14 : vector<1x256xf32>
    %cst_7 = arith.constant 9.99999974E-6 : f32
    %16 = vector.broadcast %cst_7 : f32 to vector<1x256xf32>
    %17 = arith.addf %15, %16 : vector<1x256xf32>
    %18 = math.rsqrt %17 : vector<1x256xf32>
    %c0_8 = arith.constant 0 : index
    %c0_9 = arith.constant 0 : index
    %19 = vector.load %arg3[%c0_8, %c0_9] : memref<2x256xf32, #tpu.memory_space<vmem>>, vector<1x256xf32>
    %c1 = arith.constant 1 : index
    %c0_10 = arith.constant 0 : index
    %20 = vector.load %arg3[%c1, %c0_10] : memref<2x256xf32, #tpu.memory_space<vmem>>, vector<1x256xf32>
    %21 = arith.mulf %18, %19 : vector<1x256xf32>
    %22 = arith.mulf %8, %21 : vector<1x256xf32>
    %23 = arith.subf %20, %22 : vector<1x256xf32>
    %24 = vector.broadcast %21 : vector<1x256xf32> to vector<128x256xf32>
    %25 = arith.mulf %4, %24 : vector<128x256xf32>
    %26 = vector.broadcast %23 : vector<1x256xf32> to vector<128x256xf32>
    %27 = arith.addf %25, %26 : vector<128x256xf32>
    %c0_11 = arith.constant 0 : index
    %c0_12 = arith.constant 0 : index
    %28 = vector.load %arg4[%c0_11, %c0_12] : memref<128x256xf32, #tpu.memory_space<vmem>>, vector<128x256xf32>
    tpu.vector_store %arg4[%c0_11, %c0_12], %27 {strides = array<i32>} : memref<128x256xf32, #tpu.memory_space<vmem>>, vector<128x256xf32>,
    return
  }
  func.func @transform_0(%arg0: i32) -> (i32, i32) {
    %c0_i32 = arith.constant 0 : i32
    %c0_i32_0 = arith.constant 0 : i32
    %c0_i32_1 = arith.constant 0 : i32
    return %c0_i32, %c0_i32_0 : i32, i32
  }
  func.func @transform_1(%arg0: i32) -> (i32, i32) {
    %c0_i32 = arith.constant 0 : i32
    %c0_i32_0 = arith.constant 0 : i32
    return %arg0, %c0_i32 : i32, i32
  }
  func.func @transform_2(%arg0: i32) -> (i32, i32) {
    %c0_i32 = arith.constant 0 : i32
    %c0_i32_0 = arith.constant 0 : i32
    return %c0_i32, %arg0 : i32, i32
  }
  func.func @transform_3(%arg0: i32) -> (i32, i32) {
    %c0_i32 = arith.constant 0 : i32
    %c0_i32_0 = arith.constant 0 : i32
    return %c0_i32, %arg0 : i32, i32
  }
}

module attributes {stable_mosaic.version = 11 : i64} {
  func.func @proj_head_kernel(%arg0: i32, %arg1: memref<128x256xf32, #tpu.memory_space<vmem>>, %arg2: memref<256x256xf32, #tpu.memory_space<vmem>>, %arg3: memref<2x256xf32, #tpu.memory_space<vmem>>, %arg4: memref<128x256xf32, #tpu.memory_space<vmem>>) attributes {dimension_semantics = [#tpu.dimension_semantics<parallel>], iteration_bounds = array<i64: 1>, scalar_prefetch = 0 : i64, scratch_operands = 0 : i64, tpu.core_type = #tpu.core_type<tc>, window_params = [{pipeline_mode = #tpu.pipeline_mode<synchronous>, transform_indices = @transform_0, window_bounds = array<i64: 128, 256>}, {transform_indices = @transform_1, window_bounds = array<i64: 256, 256>}, {transform_indices = @transform_2, window_bounds = array<i64: 2, 256>}, {transform_indices = @transform_3, window_bounds = array<i64: 128, 256>}]} {
    %c0 = arith.constant 0 : index
    %c0_0 = arith.constant 0 : index
    %0 = vector.load %arg1[%c0, %c0_0] : memref<128x256xf32, #tpu.memory_space<vmem>>, vector<128x256xf32>
    %1 = arith.truncf %0 : vector<128x256xf32> to vector<128x256xbf16>
    %c0_1 = arith.constant 0 : index
    %c0_2 = arith.constant 0 : index
    %2 = vector.load %arg2[%c0_1, %c0_2] : memref<256x256xf32, #tpu.memory_space<vmem>>, vector<256x256xf32>
    %3 = arith.truncf %2 : vector<256x256xf32> to vector<256x256xbf16>
    %cst = arith.constant dense<0.000000e+00> : vector<128x256xf32>
    %4 = tpu.matmul %1, %3, %cst {dimension_numbers = #tpu.dot_dimension_numbers<[1], [1], [0], [0], [0, 0, 1, 0], [], []>} : vector<128x256xbf16>, vector<256x256xbf16>, vector<128x256xf32> -> vector<128x256xf32>
    %cst_3 = arith.constant dense<0.000000e+00> : vector<256xf32>
    %5 = vector.multi_reduction <add>, %4, %cst_3 [0] : vector<128x256xf32> to vector<256xf32>
    %6 = vector.shape_cast %5 : vector<256xf32> to vector<1x256xf32>
    %cst_4 = arith.constant 7.812500e-03 : f32
    %7 = vector.broadcast %cst_4 : f32 to vector<1x256xf32>
    %8 = arith.mulf %6, %7 : vector<1x256xf32>
    %9 = arith.mulf %4, %4 : vector<128x256xf32>
    %cst_5 = arith.constant dense<0.000000e+00> : vector<256xf32>
    %10 = vector.multi_reduction <add>, %9, %cst_5 [0] : vector<128x256xf32> to vector<256xf32>
    %11 = vector.shape_cast %10 : vector<256xf32> to vector<1x256xf32>
    %cst_6 = arith.constant 7.812500e-03 : f32
    %12 = vector.broadcast %cst_6 : f32 to vector<1x256xf32>
    %13 = arith.mulf %11, %12 : vector<1x256xf32>
    %14 = arith.mulf %8, %8 : vector<1x256xf32>
    %15 = arith.subf %13, %14 : vector<1x256xf32>
    %cst_7 = arith.constant 9.99999974E-6 : f32
    %16 = vector.broadcast %cst_7 : f32 to vector<1x256xf32>
    %17 = arith.addf %15, %16 : vector<1x256xf32>
    %18 = math.rsqrt %17 : vector<1x256xf32>
    %c0_8 = arith.constant 0 : index
    %c0_9 = arith.constant 0 : index
    %19 = vector.load %arg3[%c0_8, %c0_9] : memref<2x256xf32, #tpu.memory_space<vmem>>, vector<1x256xf32>
    %c1 = arith.constant 1 : index
    %c0_10 = arith.constant 0 : index
    %20 = vector.load %arg3[%c1, %c0_10] : memref<2x256xf32, #tpu.memory_space<vmem>>, vector<1x256xf32>
    %21 = arith.mulf %18, %19 : vector<1x256xf32>
    %22 = arith.mulf %8, %21 : vector<1x256xf32>
    %23 = arith.subf %20, %22 : vector<1x256xf32>
    %24 = vector.broadcast %21 : vector<1x256xf32> to vector<128x256xf32>
    %25 = arith.mulf %4, %24 : vector<128x256xf32>
    %26 = vector.broadcast %23 : vector<1x256xf32> to vector<128x256xf32>
    %27 = arith.addf %25, %26 : vector<128x256xf32>
    %c0_11 = arith.constant 0 : index
    %c0_12 = arith.constant 0 : index
    %28 = vector.load %arg4[%c0_11, %c0_12] : memref<128x256xf32, #tpu.memory_space<vmem>>, vector<128x256xf32>
    tpu.vector_store %arg4[%c0_11, %c0_12], %27 {strides = array<i32>} : memref<128x256xf32, #tpu.memory_space<vmem>>, vector<128x256xf32>,
    return
  }
  func.func @transform_0(%arg0: i32) -> (i32, i32) {
    %c0_i32 = arith.constant 0 : i32
    %c0_i32_0 = arith.constant 0 : i32
    %c0_i32_1 = arith.constant 0 : i32
    return %c0_i32, %c0_i32_0 : i32, i32
  }
  func.func @transform_1(%arg0: i32) -> (i32, i32) {
    %c0_i32 = arith.constant 0 : i32
    %c0_i32_0 = arith.constant 0 : i32
    return %arg0, %c0_i32 : i32, i32
  }
  func.func @transform_2(%arg0: i32) -> (i32, i32) {
    %c0_i32 = arith.constant 0 : i32
    %c0_i32_0 = arith.constant 0 : i32
    return %c0_i32, %arg0 : i32, i32
  }
  func.func @transform_3(%arg0: i32) -> (i32, i32) {
    %c0_i32 = arith.constant 0 : i32
    %c0_i32_0 = arith.constant 0 : i32
    return %c0_i32, %arg0 : i32, i32
  }
}

</mosaic_0001>

<bundles_post_ra>
// kernel: tpu_custom_call.1
= control target key start
LH: loop header
LB: loop body
LE: loop exit
PB: predicated region body
PF: predicated region fallthrough
CT: control target
= control target key end

     0   :  { %8 = vsyncpa [#allocation3], 0  ;;  %s990_s0 = inlined_call_operand.hbm [shape: f32[128,256], index: 0, kind: input, shape index: {}]   ;;  %s991_s1 = inlined_call_operand.hbm [shape: f32[256,256], index: 1, kind: input, shape index: {}]   ;;  %s992_s2 = inlined_call_operand.hbm [shape: f32[2,256], index: 2, kind: input, shape index: {}]   ;;  %s993_s3 = inlined_call_operand.hbm [shape: f32[128,256], index: 3, kind: output, shape index: {}]  }
   0x1   :  { %9 = vsyncpa [#allocation6], 0 }
   0x2   :  { %10 = vsyncpa [#allocation4], 0  ;;  %s738_s12 = smov [#allocation5]   ;;  %s739_s14 = smov [#allocation2]  }
   0x3   :  { %s28_s13 = sshll.u32 %s738_s12, 4  ;;  %s16_s15 = sshll.u32 %s739_s14, 4  ;;  %s29_s13 = int_to_ptr.vmem [resolvable:$true] %s28_s13  ;;  %s17_s15 = int_to_ptr.vmem [resolvable:$true] %s16_s15 }
   0x4   :  { %s660_s16 = scalar_lea.vmem %s29_s13, 8192  ;;  %p665_p1 = scmp.lt.s32.totalorder %s29_s13, %s29_s13 }
   0x5   :  { %p661_p0 = scmp.ne.s32.totalorder %s29_s13, %s660_s16  ;;  %p666_p2 = scmp.lt.s32.totalorder %s660_s16, %s660_s16 }
   0x7   :  { %p667_p3 = por %p666_p2, %p665_p1 }
   0x9   :  { %p668_p4 = pnand %p667_p3, %p661_p0 }
   0xb   :  { %671 = shalt.err (!%p668_p4)
}
   0xc   :  { %s740_s17 = smov 256   ;;  %s741_s18 = smov 16  }
   0xd   :  { %34 = dma.hbm_to_vmem [thread:$0]  %s991_s1, 8192, %s29_s13, [#allocation6], %s740_s17, %s740_s17, %s741_s18  }
   0xe   :  { %s680_s21 = scalar_lea.vmem %s17_s15, 4096  ;;  %p685_p6 = scmp.lt.s32.totalorder %s17_s15, %s17_s15 }
   0xf   :  { %p681_p5 = scmp.ne.s32.totalorder %s17_s15, %s680_s21  ;;  %p686_p7 = scmp.lt.s32.totalorder %s680_s21, %s680_s21 }
  0x11   :  { %p687_p8 = por %p686_p7, %p685_p6 }
  0x13   :  { %p688_p9 = pnand %p687_p8, %p681_p5 }
  0x15   :  { %691 = shalt.err (!%p688_p9)
}
  0x16   :  { %22 = dma.hbm_to_vmem [thread:$0]  %s990_s0, 4096, %s17_s15, [#allocation3], %s740_s17, %s740_s17, %s741_s18  }
  0x17   :  { %s742_s24 = smov [#allocation7]  }
  0x18   :  { %s41_s25 = sshll.u32 %s742_s24, 4  ;;  %s42_s25 = int_to_ptr.vmem [resolvable:$true] %s41_s25 }
  0x19   :  { %s700_s26 = scalar_lea.vmem %s42_s25, 64  ;;  %p705_p11 = scmp.lt.s32.totalorder %s42_s25, %s42_s25 }
  0x1a   :  { %p701_p10 = scmp.ne.s32.totalorder %s42_s25, %s700_s26  ;;  %p706_p12 = scmp.lt.s32.totalorder %s700_s26, %s700_s26 }
  0x1c   :  { %p707_p13 = por %p706_p12, %p705_p11 }
  0x1e   :  { %p708_p0 = pnand %p707_p13, %p701_p10 }
  0x20   :  { %711 = shalt.err (!%p708_p0)
}
  0x21   :  { %44 = dma.hbm_to_vmem [thread:$0]  %s992_s2, 64, %s42_s25, [#allocation6]  }
  0x22   :  { %732 = dma.done.wait [#allocation3], 4096  }
  0x23   :  { %733 = vsyncadd [#allocation3], 4294963200 }
  0x24   :  { %734 = dma.done.wait [#allocation6], 8256  }
  0x25   :  { %735 = vsyncadd [#allocation6], 4294959040  ;;  %v131_v0 = vld [vmem:[#allocation5 + $0xe8] sm:$0xff]  ;;  %v133_v1 = vld [vmem:[#allocation5 + $0xf8] sm:$0xff]  ;;  %s744_s0 = smov [#allocation8]  }
  0x26   :  { %v130_v2 = vld [vmem:[#allocation5 + $0xe0] sm:$0xff]  ;;  %v181_v3 = vpack.c.bf16 %v133_v1, %v131_v0  ;;  %v132_v4 = vld [vmem:[#allocation5 + $0xf0] sm:$0xff]  ;;  %v127_v5 = vld [vmem:[#allocation5 + $0xc8] sm:$0xff]  ;;  %s596_s2 = sshll.u32 %s744_s0, 4  ;;  %s597_s2 = int_to_ptr.vmem [resolvable:$true] %s596_s2 }
  0x27   :  { %v129_v6 = vld [vmem:[#allocation5 + $0xd8] sm:$0xff]  ;;  %v180_v7 = vpack.c.bf16 %v132_v4, %v130_v2  ;;  %v126_v9 = vld [vmem:[#allocation5 + $0xc0] sm:$0xff]  ;;  %v128_v10 = vld [vmem:[#allocation5 + $0xd0] sm:$0xff]  ;;  %s712_s28 = scalar_lea.vmem %s597_s2, 4096  ;;  %p717_p2 = scmp.lt.s32.totalorder %s597_s2, %s597_s2 }
  0x28   :  { %v179_v8 = vpack.c.bf16 %v129_v6, %v127_v5  ;;  %198 = vmatprep.subr.bf16.mxu0 %v181_v3  ;;  %609 = vmatprep.subr.bf16.mxu1 %v181_v3  ;;  %v123_v11 = vld [vmem:[#allocation5 + $0xa8] sm:$0xff]  ;;  %v125_v12 = vld [vmem:[#allocation5 + $0xb8] sm:$0xff]  ;;  %v178_v13 = vpack.c.bf16 %v128_v10, %v126_v9  ;;  %v122_v15 = vld [vmem:[#allocation5 + $0xa0] sm:$0xff]  ;;  %p713_p1 = scmp.ne.s32.totalorder %s597_s2, %s712_s28  ;;  %p718_p3 = scmp.lt.s32.totalorder %s712_s28, %s712_s28 }
  0x29   :  { %199 = vmatpush1.bf16.xpose.msra.mxu0 %v180_v7  ;;  %625 = vmatpush1.bf16.xpose.msra.mxu1 %v180_v7  ;;  %v177_v14 = vpack.c.bf16 %v125_v12, %v123_v11  ;;  %v124_v16 = vld [vmem:[#allocation5 + $0xb0] sm:$0xff]  ;;  %v119_v17 = vld [vmem:[#allocation5 + $0x88] sm:$0xff]  ;;  %v121_v18 = vld [vmem:[#allocation5 + $0x98] sm:$0xff] }
  0x2a   :  { %200 = vmatprep.subr.bf16.mxu0 %v179_v8  ;;  %610 = vmatprep.subr.bf16.mxu1 %v179_v8  ;;  %v176_v19 = vpack.c.bf16 %v124_v16, %v122_v15  ;;  %v175_v20 = vpack.c.bf16 %v121_v18, %v119_v17  ;;  %v118_v21 = vld [vmem:[#allocation5 + $0x80] sm:$0xff]  ;;  %v120_v22 = vld [vmem:[#allocation5 + $0x90] sm:$0xff]  ;;  %v55_v23 = vld [vmem:[#allocation2 + $0x8] sm:$0xff]  ;;  %p719_p4 = por %p718_p3, %p717_p2 }
  0x2b   :  { %v57_v24 = vld [vmem:[#allocation2 + $0x18] sm:$0xff]  ;;  %v115_v25 = vld [vmem:[#allocation5 + $0x68] sm:$0xff]  ;;  %v174_v28 = vpack.c.bf16 %v120_v22, %v118_v21  ;;  %v114_v33 = vld [vmem:[#allocation5 + $0x60] sm:$0xff] }
  0x2c   :  { %v117_v26 = vld [vmem:[#allocation5 + $0x78] sm:$0xff]  ;;  %v87_v27 = vpack.c.bf16 %v57_v24, %v55_v23  ;;  %v71_v29 = vld [vmem:[#allocation2 + $0x88] sm:$0xff]  ;;  %v116_v34 = vld [vmem:[#allocation5 + $0x70] sm:$0xff]  ;;  %p720_p5 = pnand %p719_p4, %p713_p1 }
  0x2d   :  { %v73_v30 = vld [vmem:[#allocation2 + $0x98] sm:$0xff]  ;;  %v173_v31 = vpack.c.bf16 %v117_v26, %v115_v25  ;;  %v111_v35 = vld [vmem:[#allocation5 + $0x48] sm:$0xff]  ;;  %v172_v37 = vpack.c.bf16 %v116_v34, %v114_v33  ;;  %v110_v39 = vld [vmem:[#allocation5 + $0x40] sm:$0xff] }
  0x2e   :  { %230 = vmatprep.mubr.bf16.mxu0 %v87_v27  ;;  %v95_v32 = vpack.c.bf16 %v73_v30, %v71_v29  ;;  %v113_v36 = vld [vmem:[#allocation5 + $0x58] sm:$0xff]  ;;  %v112_v40 = vld [vmem:[#allocation5 + $0x50] sm:$0xff]  ;;  %v107_v41 = vld [vmem:[#allocation5 + $0x28] sm:$0xff] }
  0x2f   :  { %v171_v38 = vpack.c.bf16 %v113_v36, %v111_v35  ;;  %v109_v42 = vld [vmem:[#allocation5 + $0x38] sm:$0xff]  ;;  %v170_v43 = vpack.c.bf16 %v112_v40, %v110_v39  ;;  %v106_v45 = vld [vmem:[#allocation5 + $0x20] sm:$0xff]  ;;  %v108_v46 = vld [vmem:[#allocation5 + $0x30] sm:$0xff] }
  0x30   :  { %270 = vmatprep.mubr.bf16.mxu1 %v95_v32  ;;  %v169_v44 = vpack.c.bf16 %v109_v42, %v107_v41  ;;  %v103_v47 = vld [vmem:[#allocation5 + $0x8] sm:$0xff]  ;;  %v105_v48 = vld [vmem:[#allocation5 + $0x18] sm:$0xff]  ;;  %v168_v49 = vpack.c.bf16 %v108_v46, %v106_v45  ;;  %v102_v51 = vld [vmem:[#allocation5] sm:$0xff] }
  0x31   :  { %201 = vmatpush1.bf16.xpose.msra.mxu0 %v178_v13  ;;  %626 = vmatpush1.bf16.xpose.msra.mxu1 %v178_v13  ;;  %v167_v50 = vpack.c.bf16 %v105_v48, %v103_v47  ;;  %v104_v52 = vld [vmem:[#allocation5 + $0x10] sm:$0xff]  ;;  %v163_v53 = vld [vmem:[#allocation5 + $0x1e8] sm:$0xff]  ;;  %v165_v54 = vld [vmem:[#allocation5 + $0x1f8] sm:$0xff] }
  0x32   :  { %202 = vmatprep.subr.bf16.mxu0 %v177_v14  ;;  %611 = vmatprep.subr.bf16.mxu1 %v177_v14  ;;  %v166_v55 = vpack.c.bf16 %v104_v52, %v102_v51  ;;  %v197_v56 = vpack.c.bf16 %v165_v54, %v163_v53  ;;  %v162_v57 = vld [vmem:[#allocation5 + $0x1e0] sm:$0xff]  ;;  %v164_v58 = vld [vmem:[#allocation5 + $0x1f0] sm:$0xff]  ;;  %v159_v59 = vld [vmem:[#allocation5 + $0x1c8] sm:$0xff] }
  0x33   :  { %v161_v60 = vld [vmem:[#allocation5 + $0x1d8] sm:$0xff]  ;;  %v196_v61 = vpack.c.bf16 %v164_v58, %v162_v57  ;;  %v158_v63 = vld [vmem:[#allocation5 + $0x1c0] sm:$0xff]  ;;  %v160_v0 = vld [vmem:[#allocation5 + $0x1d0] sm:$0xff] }
  0x34   :  { %v195_v62 = vpack.c.bf16 %v161_v60, %v159_v59  ;;  %v155_v1 = vld [vmem:[#allocation5 + $0x1a8] sm:$0xff]  ;;  %v157_v2 = vld [vmem:[#allocation5 + $0x1b8] sm:$0xff]  ;;  %v194_v3 = vpack.c.bf16 %v160_v0, %v158_v63  ;;  %v154_v5 = vld [vmem:[#allocation5 + $0x1a0] sm:$0xff] }
  0x35   :  { %v193_v4 = vpack.c.bf16 %v157_v2, %v155_v1  ;;  %v156_v6 = vld [vmem:[#allocation5 + $0x1b0] sm:$0xff]  ;;  %v151_v7 = vld [vmem:[#allocation5 + $0x188] sm:$0xff]  ;;  %v153_v8 = vld [vmem:[#allocation5 + $0x198] sm:$0xff] }
  0x36   :  { %v192_v9 = vpack.c.bf16 %v156_v6, %v154_v5  ;;  %v191_v10 = vpack.c.bf16 %v153_v8, %v151_v7  ;;  %v150_v11 = vld [vmem:[#allocation5 + $0x180] sm:$0xff]  ;;  %v152_v12 = vld [vmem:[#allocation5 + $0x190] sm:$0xff]  ;;  %v147_v13 = vld [vmem:[#allocation5 + $0x168] sm:$0xff] }
  0x37   :  { %v149_v14 = vld [vmem:[#allocation5 + $0x178] sm:$0xff]  ;;  %v190_v15 = vpack.c.bf16 %v152_v12, %v150_v11  ;;  %v146_v17 = vld [vmem:[#allocation5 + $0x160] sm:$0xff]  ;;  %v148_v18 = vld [vmem:[#allocation5 + $0x170] sm:$0xff] }
  0x38   :  { %v189_v16 = vpack.c.bf16 %v149_v14, %v147_v13  ;;  %v188_v21 = vpack.c.bf16 %v148_v18, %v146_v17  ;;  %v142_v23 = vld [vmem:[#allocation5 + $0x140] sm:$0xff]  ;;  %v144_v24 = vld [vmem:[#allocation5 + $0x150] sm:$0xff]  ;;  %v139_v25 = vld [vmem:[#allocation5 + $0x128] sm:$0xff] }
  0x39   :  { %203 = vmatpush1.bf16.xpose.msra.mxu0 %v176_v19  ;;  %627 = vmatpush1.bf16.xpose.msra.mxu1 %v176_v19  ;;  %v143_v19 = vld [vmem:[#allocation5 + $0x148] sm:$0xff]  ;;  %v141_v26 = vld [vmem:[#allocation5 + $0x138] sm:$0xff]  ;;  %v186_v27 = vpack.c.bf16 %v144_v24, %v142_v23  ;;  %v138_v29 = vld [vmem:[#allocation5 + $0x120] sm:$0xff] }
  0x3a   :  { %204 = vmatprep.subr.bf16.mxu0 %v175_v20  ;;  %612 = vmatprep.subr.bf16.mxu1 %v175_v20  ;;  %v145_v20 = vld [vmem:[#allocation5 + $0x158] sm:$0xff]  ;;  %v140_v30 = vld [vmem:[#allocation5 + $0x130] sm:$0xff]  ;;  %v134_v35 = vld [vmem:[#allocation5 + $0x100] sm:$0xff] }
  0x3b   :  { %v187_v22 = vpack.c.bf16 %v145_v20, %v143_v19  ;;  %v137_v32 = vld [vmem:[#allocation5 + $0x118] sm:$0xff]  ;;  %v184_v33 = vpack.c.bf16 %v140_v30, %v138_v29  ;;  %v136_v36 = vld [vmem:[#allocation5 + $0x110] sm:$0xff]  ;;  %v59_v40 = vld [vmem:[#allocation2 + $0x28] sm:$0xff] }
  0x3c   :  { %v56_v39 = vld [vmem:[#allocation2 + $0x10] sm:$0xff]  ;;  %v70_v41 = vld [vmem:[#allocation2 + $0x80] sm:$0xff]  ;;  %v77_v45 = vld [vmem:[#allocation2 + $0xb8] sm:$0xff] }
  0x3d   :  { %v72_v42 = vld [vmem:[#allocation2 + $0x90] sm:$0xff]  ;;  %v63_v52 = vld [vmem:[#allocation2 + $0x48] sm:$0xff]  ;;  %v74_v53 = vld [vmem:[#allocation2 + $0xa0] sm:$0xff] }
  0x3e   :  { %v94_v47 = vpack.c.bf16 %v72_v42, %v70_v41  ;;  %v60_v51 = vld [vmem:[#allocation2 + $0x30] sm:$0xff]  ;;  %v81_v57 = vld [vmem:[#allocation2 + $0xd8] sm:$0xff]  ;;  %v67_v0 = vld [vmem:[#allocation2 + $0x68] sm:$0xff] }
  0x3f   :  { %v76_v54 = vld [vmem:[#allocation2 + $0xb0] sm:$0xff]  ;;  %v78_v1 = vld [vmem:[#allocation2 + $0xc0] sm:$0xff]  ;;  %v85_v5 = vld [vmem:[#allocation2 + $0xf8] sm:$0xff] }
  0x40   :  { %v96_v59 = vpack.c.bf16 %v76_v54, %v74_v53  ;;  %v64_v63 = vld [vmem:[#allocation2 + $0x50] sm:$0xff]  ;;  %v82_v12 = vld [vmem:[#allocation2 + $0xe0] sm:$0xff] }
  0x41   :  { %205 = vmatpush1.bf16.xpose.msra.mxu0 %v174_v28  ;;  %628 = vmatpush1.bf16.xpose.msra.mxu1 %v174_v28  ;;  %v185_v28 = vpack.c.bf16 %v141_v26, %v139_v25  ;;  %v80_v2 = vld [vmem:[#allocation2 + $0xd0] sm:$0xff] }
  0x42   :  { %206 = vmatprep.subr.bf16.mxu0 %v173_v31  ;;  %613 = vmatprep.subr.bf16.mxu1 %v173_v31  ;;  %v135_v31 = vld [vmem:[#allocation5 + $0x108] sm:$0xff]  ;;  %v98_v7 = vpack.c.bf16 %v80_v2, %v78_v1  ;;  %v68_v11 = vld [vmem:[#allocation2 + $0x70] sm:$0xff] }
  0x43   :  { %v183_v34 = vpack.c.bf16 %v137_v32, %v135_v31  ;;  %v84_v13 = vld [vmem:[#allocation2 + $0xf0] sm:$0xff] }
  0x49   :  { %207 = vmatpush1.bf16.xpose.msra.mxu0 %v172_v37  ;;  %629 = vmatpush1.bf16.xpose.msra.mxu1 %v172_v37  ;;  %v182_v37 = vpack.c.bf16 %v136_v36, %v134_v35 }
  0x4a   :  { %208 = vmatprep.subr.bf16.mxu0 %v171_v38  ;;  %614 = vmatprep.subr.bf16.mxu1 %v171_v38  ;;  %v54_v38 = vld [vmem:[#allocation2] sm:$0xff] }
  0x4b   :  { %v86_v46 = vpack.c.bf16 %v56_v39, %v54_v38 }
  0x51   :  { %209 = vmatpush1.bf16.xpose.msra.mxu0 %v170_v43  ;;  %630 = vmatpush1.bf16.xpose.msra.mxu1 %v170_v43  ;;  %v61_v43 = vld [vmem:[#allocation2 + $0x38] sm:$0xff] }
  0x52   :  { %210 = vmatprep.subr.bf16.mxu0 %v169_v44  ;;  %615 = vmatprep.subr.bf16.mxu1 %v169_v44  ;;  %v75_v44 = vld [vmem:[#allocation2 + $0xa8] sm:$0xff]  ;;  %v89_v48 = vpack.c.bf16 %v61_v43, %v59_v40 }
  0x59   :  { %211 = vmatpush1.bf16.xpose.msra.mxu0 %v168_v49  ;;  %631 = vmatpush1.bf16.xpose.msra.mxu1 %v168_v49  ;;  %v97_v49 = vpack.c.bf16 %v77_v45, %v75_v44 }
  0x5a   :  { %212 = vmatprep.subr.bf16.mxu0 %v167_v50  ;;  %616 = vmatprep.subr.bf16.mxu1 %v167_v50  ;;  %v58_v50 = vld [vmem:[#allocation2 + $0x20] sm:$0xff] }
  0x5b   :  { %v88_v58 = vpack.c.bf16 %v60_v51, %v58_v50 }
  0x61   :  { %213 = vmatpush1.bf16.xpose.msra.mxu0 %v166_v55  ;;  %632 = vmatpush1.bf16.xpose.msra.mxu1 %v166_v55  ;;  %v65_v55 = vld [vmem:[#allocation2 + $0x58] sm:$0xff] }
  0x62   :  { %214 = vmatprep.subr.bf16.mxu0 %v197_v56  ;;  %617 = vmatprep.subr.bf16.mxu1 %v197_v56  ;;  %v79_v56 = vld [vmem:[#allocation2 + $0xc8] sm:$0xff]  ;;  %v91_v60 = vpack.c.bf16 %v65_v55, %v63_v52 }
  0x69   :  { %215 = vmatpush2.bf16.xpose.msra.mxu0 %v196_v61  ;;  %633 = vmatpush2.bf16.xpose.msra.mxu1 %v196_v61  ;;  %v99_v61 = vpack.c.bf16 %v81_v57, %v79_v56 }
  0x6a   :  { %216 = vmatprep.subr.bf16.mxu0 %v195_v62  ;;  %618 = vmatprep.subr.bf16.mxu1 %v195_v62  ;;  %v62_v62 = vld [vmem:[#allocation2 + $0x40] sm:$0xff] }
  0x6b   :  { %v90_v6 = vpack.c.bf16 %v64_v63, %v62_v62 }
  0x71   :  { %217 = vmatpush2.bf16.xpose.msra.mxu0 %v194_v3  ;;  %634 = vmatpush2.bf16.xpose.msra.mxu1 %v194_v3  ;;  %v69_v3 = vld [vmem:[#allocation2 + $0x78] sm:$0xff] }
  0x72   :  { %218 = vmatprep.subr.bf16.mxu0 %v193_v4  ;;  %619 = vmatprep.subr.bf16.mxu1 %v193_v4  ;;  %v83_v4 = vld [vmem:[#allocation2 + $0xe8] sm:$0xff]  ;;  %v93_v8 = vpack.c.bf16 %v69_v3, %v67_v0 }
  0x79   :  { %219 = vmatpush2.bf16.xpose.msra.mxu0 %v192_v9  ;;  %635 = vmatpush2.bf16.xpose.msra.mxu1 %v192_v9  ;;  %v101_v9 = vpack.c.bf16 %v85_v5, %v83_v4 }
  0x7a   :  { %220 = vmatprep.subr.bf16.mxu0 %v191_v10  ;;  %620 = vmatprep.subr.bf16.mxu1 %v191_v10  ;;  %v66_v10 = vld [vmem:[#allocation2 + $0x60] sm:$0xff] }
  0x7b   :  { %v92_v14 = vpack.c.bf16 %v68_v11, %v66_v10 }
  0x81   :  { %221 = vmatpush2.bf16.xpose.msra.mxu0 %v190_v15  ;;  %636 = vmatpush2.bf16.xpose.msra.mxu1 %v190_v15  ;;  %v100_v15 = vpack.c.bf16 %v84_v13, %v82_v12 }
  0x82   :  { %222 = vmatprep.subr.bf16.mxu0 %v189_v16  ;;  %621 = vmatprep.subr.bf16.mxu1 %v189_v16 }
  0x89   :  { %223 = vmatpush2.bf16.xpose.msra.mxu0 %v188_v21  ;;  %637 = vmatpush2.bf16.xpose.msra.mxu1 %v188_v21 }
  0x8a   :  { %224 = vmatprep.subr.bf16.mxu0 %v187_v22  ;;  %622 = vmatprep.subr.bf16.mxu1 %v187_v22 }
  0x91   :  { %225 = vmatpush2.bf16.xpose.msra.mxu0 %v186_v27  ;;  %638 = vmatpush2.bf16.xpose.msra.mxu1 %v186_v27 }
  0x92   :  { %226 = vmatprep.subr.bf16.mxu0 %v185_v28  ;;  %623 = vmatprep.subr.bf16.mxu1 %v185_v28 }
  0x99   :  { %227 = vmatpush2.bf16.xpose.msra.mxu0 %v184_v33  ;;  %639 = vmatpush2.bf16.xpose.msra.mxu1 %v184_v33 }
  0x9a   :  { %228 = vmatprep.subr.bf16.mxu0 %v183_v34  ;;  %624 = vmatprep.subr.bf16.mxu1 %v183_v34 }
  0xa1   :  { %229 = vmatpush2.bf16.xpose.msra.mxu0 %v182_v37  ;;  %640 = vmatpush2.bf16.xpose.msra.mxu1 %v182_v37 }
  0xa8   :  { %231 = vmatmul.mubr.bf16.vlgmr.msra.gmra.mxu0 %v86_v46  ;;  %271 = vmatmul.mubr.bf16.vlgmr.msra.gmra.mxu1 %v94_v47 }
  0xa9   :  { %240 = vmatprep.mubr.bf16.mxu0 %v89_v48  ;;  %280 = vmatprep.mubr.bf16.mxu1 %v97_v49 }
  0xb0   :  { %241 = vmatmul.mubr.bf16.gmra.mxu0 %v88_v58  ;;  %281 = vmatmul.mubr.bf16.gmra.mxu1 %v96_v59 }
  0xb1   :  { %250 = vmatprep.mubr.bf16.mxu0 %v91_v60  ;;  %290 = vmatprep.mubr.bf16.mxu1 %v99_v61 }
  0xb8   :  { %251 = vmatmul.mubr.bf16.gmra.mxu0 %v90_v6  ;;  %291 = vmatmul.mubr.bf16.gmra.mxu1 %v98_v7 }
  0xb9   :  { %260 = vmatprep.mubr.bf16.mxu0 %v93_v8  ;;  %300 = vmatprep.mubr.bf16.mxu1 %v101_v9 }
  0xc0   :  { %261 = vmatmul.mubr.bf16.gmra.mxu0 %v92_v14  ;;  %301 = vmatmul.mubr.bf16.gmra.mxu1 %v100_v15 }
 0x168   :  { %v780_v16 = vpop.f32.mrf.mxu0  ;;  %v782_v17 = vpop.f32.mrf.mxu1 }
 0x169   :  { %v355_v36 = vmul.f32 %v780_v16, %v780_v16 }
 0x16a   :  { %v784_v18 = vpop.f32.mrf.mxu0  ;;  %v786_v19 = vpop.f32.mrf.mxu1 }
 0x16b   :  { %v356_v39 = vmul.f32 %v784_v18, %v784_v18 }
 0x16c   :  { %v788_v20 = vpop.f32.mrf.mxu0  ;;  %v790_v21 = vpop.f32.mrf.mxu1 }
 0x16d   :  { %v357_v32 = vmul.f32 %v788_v20, %v788_v20  ;;  %v311_v37 = vadd.f32 %v788_v20, %v780_v16 }
 0x16e   :  { %v792_v22 = vpop.f32.mrf.mxu0  ;;  %v794_v23 = vpop.f32.mrf.mxu1 }
 0x16f   :  { %v358_v33 = vmul.f32 %v792_v22, %v792_v22  ;;  %v387_v42 = vadd.f32 %v357_v32, %v355_v36  ;;  %v332_v43 = vadd.f32 %v792_v22, %v784_v18  ;;  %v371_v36 = vmul.f32 %v782_v17, %v782_v17 }
 0x170   :  { %v796_v24 = vpop.f32.mrf.mxu0  ;;  %v798_v25 = vpop.f32.mrf.mxu1 }
 0x171   :  { %v359_v38 = vmul.f32 %v796_v24, %v796_v24  ;;  %v312_v44 = vadd.f32 %v311_v37, %v796_v24  ;;  %v408_v47 = vadd.f32 %v358_v33, %v356_v39 }
 0x172   :  { %v800_v26 = vpop.f32.mrf.mxu0  ;;  %v802_v27 = vpop.f32.mrf.mxu1 }
 0x173   :  { %v360_v40 = vmul.f32 %v800_v26, %v800_v26  ;;  %v388_v50 = vadd.f32 %v387_v42, %v359_v38  ;;  %v333_v51 = vadd.f32 %v332_v43, %v800_v26 }
 0x174   :  { %v804_v28 = vpop.f32.mrf.mxu0  ;;  %v806_v29 = vpop.f32.mrf.mxu1 }
 0x175   :  { %v361_v45 = vmul.f32 %v804_v28, %v804_v28  ;;  %v313_v52 = vadd.f32 %v312_v44, %v804_v28  ;;  %v409_v54 = vadd.f32 %v408_v47, %v360_v40  ;;  %v373_v47 = vmul.f32 %v790_v21, %v790_v21 }
 0x176   :  { %v808_v30 = vpop.f32.mrf.mxu0  ;;  %v810_v31 = vpop.f32.mrf.mxu1 }
 0x177   :  { %v362_v48 = vmul.f32 %v808_v30, %v808_v30  ;;  %v389_v57 = vadd.f32 %v388_v50, %v361_v45  ;;  %v334_v58 = vadd.f32 %v333_v51, %v808_v30  ;;  %v372_v45 = vmul.f32 %v786_v19, %v786_v19 }
 0x178   :  { %v816_v34 = vpop.f32.mrf.mxu0  ;;  %v818_v35 = vpop.f32.mrf.mxu1 }
 0x179   :  { %v363_v53 = vmul.f32 %v816_v34, %v816_v34  ;;  %v314_v59 = vadd.f32 %v313_v52, %v816_v34  ;;  %v410_v62 = vadd.f32 %v409_v54, %v362_v48  ;;  %v375_v54 = vmul.f32 %v798_v25, %v798_v25 }
 0x17a   :  { %v830_v41 = vpop.f32.mrf.mxu0  ;;  %v837_v46 = vpop.f32.mrf.mxu1 }
 0x17b   :  { %v364_v55 = vmul.f32 %v830_v41, %v830_v41  ;;  %v390_v1 = vadd.f32 %v389_v57, %v363_v53  ;;  %v335_v2 = vadd.f32 %v334_v58, %v830_v41  ;;  %v374_v53 = vmul.f32 %v794_v23, %v794_v23 }
 0x17c   :  { %v841_v49 = vpop.f32.mrf.mxu0  ;;  %v855_v61 = vpop.f32.mrf.mxu1 }
 0x17d   :  { %v365_v60 = vmul.f32 %v841_v49, %v841_v49  ;;  %v315_v3 = vadd.f32 %v314_v59, %v841_v49  ;;  %v411_v5 = vadd.f32 %v410_v62, %v364_v55  ;;  %v376_v62 = vmul.f32 %v802_v27, %v802_v27 }
 0x17e   :  { %v849_v56 = vpop.f32.mrf.mxu0  ;;  %v871_v11 = vpop.f32.mrf.mxu1 }
 0x17f   :  { %v366_v63 = vmul.f32 %v849_v56, %v849_v56  ;;  %v391_v7 = vadd.f32 %v390_v1, %v365_v60  ;;  %v336_v8 = vadd.f32 %v335_v2, %v849_v56 }
 0x180   :  { %v859_v0 = vpop.f32.mrf.mxu0  ;;  %v887_v44 = vpop.f32.mrf.mxu1 }
 0x181   :  { %v367_v4 = vmul.f32 %v859_v0, %v859_v0  ;;  %v316_v9 = vadd.f32 %v315_v3, %v859_v0  ;;  %v412_v12 = vadd.f32 %v411_v5, %v366_v63  ;;  %v377_v63 = vmul.f32 %v806_v29, %v806_v29 }
 0x182   :  { %v865_v6 = vpop.f32.mrf.mxu0  ;;  %v901_v60 = vpop.f32.mrf.mxu1  ;;  %v378_v5 = vmul.f32 %v810_v31, %v810_v31 }
 0x183   :  { %v368_v10 = vmul.f32 %v865_v6, %v865_v6  ;;  %v392_v14 = vadd.f32 %v391_v7, %v367_v4  ;;  %v337_v15 = vadd.f32 %v336_v8, %v865_v6  ;;  %v379_v7 = vmul.f32 %v818_v35, %v818_v35 }
 0x184   :  { %v873_v13 = vpop.f32.mrf.mxu0 }
 0x185   :  { %v317_v32 = vadd.f32 %v316_v9, %v873_v13  ;;  %v369_v33 = vmul.f32 %v873_v13, %v873_v13  ;;  %v413_v37 = vadd.f32 %v412_v12, %v368_v10 }
 0x186   :  { %v881_v38 = vpop.f32.mrf.mxu0 }
 0x187   :  { %v318_v39 = vadd.f32 %v317_v32, %v782_v17  ;;  %v393_v40 = vadd.f32 %v392_v14, %v369_v33  ;;  %v338_v42 = vadd.f32 %v337_v15, %v881_v38  ;;  %v370_v43 = vmul.f32 %v881_v38, %v881_v38  ;;  %v915_v14 = vpop.f32.mrf.mxu1 }
 0x188   :  { %v380_v15 = vmul.f32 %v837_v46, %v837_v46  ;;  %v381_v32 = vmul.f32 %v855_v61, %v855_v61 }
 0x189   :  { %v319_v48 = vadd.f32 %v318_v39, %v790_v21  ;;  %v394_v50 = vadd.f32 %v393_v40, %v371_v36  ;;  %v339_v51 = vadd.f32 %v338_v42, %v786_v19  ;;  %v414_v52 = vadd.f32 %v413_v37, %v370_v43 }
 0x18a   :  { %v382_v40 = vmul.f32 %v871_v11, %v871_v11  ;;  %v383_v42 = vmul.f32 %v887_v44, %v887_v44 }
 0x18b   :  { %v395_v55 = vadd.f32 %v394_v50, %v373_v47  ;;  %v340_v57 = vadd.f32 %v339_v51, %v794_v23  ;;  %v415_v58 = vadd.f32 %v414_v52, %v372_v45  ;;  %v320_v59 = vadd.f32 %v319_v48, %v798_v25  ;;  %v929_v50 = vpop.f32.mrf.mxu1 }
 0x18c   :  { %v384_v51 = vmul.f32 %v901_v60, %v901_v60  ;;  %v385_v52 = vmul.f32 %v915_v14, %v915_v14 }
 0x18d   :  { %v341_v1 = vadd.f32 %v340_v57, %v802_v27  ;;  %v416_v2 = vadd.f32 %v415_v58, %v374_v53  ;;  %v321_v3 = vadd.f32 %v320_v59, %v806_v29  ;;  %v396_v4 = vadd.f32 %v395_v55, %v375_v54 }
 0x18e   :  { %v386_v58 = vmul.f32 %v929_v50, %v929_v50 }
 0x18f   :  { %v417_v8 = vadd.f32 %v416_v2, %v376_v62  ;;  %v322_v9 = vadd.f32 %v321_v3, %v818_v35  ;;  %v397_v10 = vadd.f32 %v396_v4, %v377_v63  ;;  %v342_v12 = vadd.f32 %v341_v1, %v810_v31 }
 0x191   :  { %v323_v33 = vadd.f32 %v322_v9, %v855_v61  ;;  %v398_v36 = vadd.f32 %v397_v10, %v379_v7  ;;  %v343_v37 = vadd.f32 %v342_v12, %v837_v46  ;;  %v418_v39 = vadd.f32 %v417_v8, %v378_v5 }
 0x193   :  { %v399_v43 = vadd.f32 %v398_v36, %v381_v32  ;;  %v344_v45 = vadd.f32 %v343_v37, %v871_v11  ;;  %v419_v47 = vadd.f32 %v418_v39, %v380_v15  ;;  %v324_v48 = vadd.f32 %v323_v33, %v887_v44 }
 0x195   :  { %v420_v53 = vadd.f32 %v419_v47, %v382_v40  ;;  %v400_v54 = vadd.f32 %v399_v43, %v383_v42  ;;  %v345_v55 = vadd.f32 %v344_v45, %v901_v60  ;;  %v325_v57 = vadd.f32 %v324_v48, %v915_v14 }
 0x197   :  { %v421_v59 = vadd.f32 %v420_v53, %v384_v51  ;;  %v326_v62 = vrot.slane %v325_v57, 4  ;;  %v401_v63 = vadd.f32 %v400_v54, %v385_v52  ;;  %v346_v1 = vadd.f32 %v345_v55, %v929_v50 }
 0x199   :  { %v327_v2 = vadd.f32 %v326_v62, %v325_v57  ;;  %v402_v3 = vrot.slane %v401_v63, 4  ;;  %v347_v4 = vrot.slane %v346_v1, 4  ;;  %v422_v5 = vadd.f32 %v421_v59, %v386_v58 }
 0x19b   :  { %v328_v7 = vrot.slane %v327_v2, 2  ;;  %v403_v8 = vadd.f32 %v402_v3, %v401_v63  ;;  %v348_v9 = vadd.f32 %v347_v4, %v346_v1  ;;  %v423_v10 = vrot.slane %v422_v5, 4 }
 0x19c   :  { %v443_v3 = vlaneseq }
 0x19d   :  { %v329_v12 = vadd.f32 %v328_v7, %v327_v2  ;;  %v404_v15 = vrot.slane %v403_v8, 2  ;;  %v349_v32 = vrot.slane %v348_v9, 2  ;;  %v424_v33 = vadd.f32 %v423_v10, %v422_v5 }
 0x19e   :  { %v444_v5 = vshrl.u32 %v443_v3, 7 }
 0x19f   :  { %v330_v36 = vrot.slane %v329_v12, 1  ;;  %v405_v37 = vadd.f32 %v404_v15, %v403_v8  ;;  %v350_v39 = vadd.f32 %v349_v32, %v348_v9  ;;  %v425_v40 = vrot.slane %v424_v33, 2  ;;  %v439_v8 = vld [vmem:[#allocation7] ss:$2 sm:$0x3] }
 0x1a0   :  { %v445_v7 = vsub.s32 0, %v444_v5  ;;  %v449_v9 = vsub.s32 1, %v444_v5  ;;  %v743_v32 = vmov 1966171168  }
 0x1a1   :  { %v331_v42 = vadd.f32 %v330_v36, %v329_v12  ;;  %v406_v43 = vrot.slane %v405_v37, 1  ;;  %v351_v45 = vrot.slane %v350_v39, 1  ;;  %v426_v47 = vadd.f32 %v425_v40, %v424_v33 }
 0x1a2   :  { %v446_v10 = vrot.slane %v439_v8, %v445_v7  ;;  %v450_v15 = vrot.slane %v439_v8, %v449_v9  ;;  %v461_v33 = vunpack.c.l.s4 %v743_v32 }
 0x1a3   :  { %v353_v48 = vmul.f32 0.0078125, %v331_v42  ;;  %v407_v51 = vadd.f32 %v406_v43, %v405_v37  ;;  %v352_v52 = vadd.f32 %v351_v45, %v350_v39  ;;  %v427_v53 = vrot.slane %v426_v47, 1 }
 0x1a4   :  { %v462_v40 = vunpack.c.0.s8 %v461_v33 }
 0x1a5   :  { %v429_v54 = vmul.f32 0.0078125, %v407_v51  ;;  %v431_v55 = vmul.f32 %v353_v48, %v353_v48  ;;  %v354_v57 = vmul.f32 0.0078125, %v352_v52  ;;  %v428_v58 = vadd.f32 %v427_v53, %v426_v47 }
 0x1a6   :  { %v465_v47 = vsub.s32 %v462_v40, %v444_v5 }
 0x1a7   :  { %v433_v59 = vsub.f32 %v429_v54, %v431_v55  ;;  %v430_v62 = vmul.f32 0.0078125, %v428_v58  ;;  %v432_v63 = vmul.f32 %v354_v57, %v354_v57 }
 0x1a9   :  { %v435_v1 = vadd.f32 1e-05, %v433_v59  ;;  %v434_v2 = vsub.f32 %v430_v62, %v432_v63 }
 0x1ab   :  { %648 = vrsqrt.f32 %v435_v1  ;;  %v436_v4 = vadd.f32 1e-05, %v434_v2  ;;  %v441_v2 = vld [vmem:[#allocation7 + $0x1] ss:$2 sm:$0x3] }
 0x1ad   :  { %650 = vrsqrt.f32 %v436_v4 }
 0x1b8   :  { %v649_v12 = vpop.eup %648 }
 0x1b9   :  { %v453_v37 = vmul.f32 %v649_v12, %v446_v10 }
 0x1ba   :  { %v651_v36 = vpop.eup %650 }
 0x1bb   :  { %v454_v39 = vmul.f32 %v651_v36, %v450_v15  ;;  %v479_v42 = vrot.slane %v453_v37, %v445_v7  ;;  %v455_v43 = vmul.f32 %v453_v37, %v353_v48 }
 0x1bd   :  { %v456_v45 = vmul.f32 %v454_v39, %v354_v57  ;;  %v484_v51 = vmul.f32 %v479_v42, %v780_v16  ;;  %v486_v52 = vmul.f32 %v479_v42, %v788_v20  ;;  %v488_v54 = vmul.f32 %v479_v42, %v796_v24 }
 0x1be   :  { %v490_v55 = vmul.f32 %v479_v42, %v804_v28  ;;  %v492_v58 = vmul.f32 %v479_v42, %v816_v34  ;;  %v483_v59 = vrot.slane %v454_v39, %v445_v7  ;;  %v494_v62 = vmul.f32 %v479_v42, %v841_v49 }
 0x1bf   :  { %v459_v53 = vcombine.low %v455_v43, %v456_v45  ;;  %v496_v63 = vmul.f32 %v479_v42, %v859_v0  ;;  %v498_v48 = vmul.f32 %v479_v42, %v873_v13  ;;  %v500_v1 = vmul.f32 %v479_v42, %v782_v17 }
 0x1c0   :  { %v502_v16 = vmul.f32 %v479_v42, %v790_v21  ;;  %v504_v20 = vmul.f32 %v479_v42, %v798_v25  ;;  %v506_v24 = vmul.f32 %v479_v42, %v806_v29  ;;  %v953_v28 = vmul.f32 %v479_v42, %v818_v35 }
 0x1c1   :  { %v466_v57 = vrot.slane %v459_v53, %v465_v47  ;;  %v956_v34 = vmul.f32 %v479_v42, %v855_v61  ;;  %v959_v49 = vmul.f32 %v479_v42, %v887_v44  ;;  %v962_v13 = vmul.f32 %v479_v42, %v915_v14 }
 0x1c2   :  { %v485_v17 = vmul.f32 %v483_v59, %v784_v18  ;;  %v487_v21 = vmul.f32 %v483_v59, %v792_v22  ;;  %v489_v25 = vmul.f32 %v483_v59, %v800_v26  ;;  %v491_v35 = vmul.f32 %v483_v59, %v808_v30 }
 0x1c3   :  { %v473_v0 = vrot.slane %v466_v57, %v465_v47  ;;  %v493_v3 = vmul.f32 %v483_v59, %v830_v41  ;;  %v495_v61 = vmul.f32 %v483_v59, %v849_v56  ;;  %v497_v44 = vmul.f32 %v483_v59, %v865_v6 }
 0x1c4   :  { %v499_v4 = vmul.f32 %v483_v59, %v881_v38  ;;  %v501_v14 = vmul.f32 %v483_v59, %v786_v19  ;;  %v503_v5 = vmul.f32 %v483_v59, %v794_v23  ;;  %v505_v18 = vmul.f32 %v483_v59, %v802_v27 }
 0x1c5   :  { %v475_v29 = vsub.f32 %v441_v2, %v473_v0  ;;  %v507_v22 = vmul.f32 %v483_v59, %v810_v31  ;;  %v509_v30 = vmul.f32 %v483_v59, %v837_v46  ;;  %v511_v41 = vmul.f32 %v483_v59, %v871_v11 }
 0x1c6   :  { %v513_v56 = vmul.f32 %v483_v59, %v901_v60  ;;  %v515_v6 = vmul.f32 %v483_v59, %v929_v50 }
 0x1c7   :  { %v520_v26 = vrot.slane %v475_v29, %v445_v7  ;;  %v524_v8 = vrot.slane %v475_v29, %v449_v9 }
 0x1c9   :  { %v527_v10 = vadd.f32 %v520_v26, %v484_v51  ;;  %v528_v38 = vadd.f32 %v524_v8, %v485_v17  ;;  %v529_v12 = vadd.f32 %v520_v26, %v486_v52  ;;  %v530_v19 = vadd.f32 %v524_v8, %v487_v21 }
 0x1ca   :  { %v531_v15 = vadd.f32 %v520_v26, %v488_v54  ;;  %v532_v23 = vadd.f32 %v524_v8, %v489_v25  ;;  %v533_v32 = vadd.f32 %v520_v26, %v490_v55  ;;  %v534_v27 = vadd.f32 %v524_v8, %v491_v35 }
 0x1cb   :  { %v535_v33 = vadd.f32 %v520_v26, %v492_v58  ;;  %v536_v31 = vadd.f32 %v524_v8, %v493_v3  ;;  %v537_v7 = vadd.f32 %v520_v26, %v494_v62  ;;  %v538_v9 = vadd.f32 %v524_v8, %v495_v61  ;;  %559 = vst [vmem:[#allocation8] sm:$0xff] %v527_v10 }
 0x1cc   :  { %560 = vst [vmem:[#allocation8 + $0x8] sm:$0xff] %v528_v38  ;;  %561 = vst [vmem:[#allocation8 + $0x10] sm:$0xff] %v529_v12  ;;  %v539_v46 = vadd.f32 %v520_v26, %v496_v63  ;;  %v540_v11 = vadd.f32 %v524_v8, %v497_v44  ;;  %v541_v60 = vadd.f32 %v520_v26, %v498_v48 }
 0x1cd   :  { %562 = vst [vmem:[#allocation8 + $0x18] sm:$0xff] %v530_v19  ;;  %v542_v50 = vadd.f32 %v524_v8, %v499_v4  ;;  %563 = vst [vmem:[#allocation8 + $0x20] sm:$0xff] %v531_v15  ;;  %v543_v36 = vadd.f32 %v520_v26, %v500_v1  ;;  %v544_v37 = vadd.f32 %v524_v8, %v501_v14 }
 0x1ce   :  { %564 = vst [vmem:[#allocation8 + $0x28] sm:$0xff] %v532_v23  ;;  %565 = vst [vmem:[#allocation8 + $0x30] sm:$0xff] %v533_v32  ;;  %v545_v39 = vadd.f32 %v520_v26, %v502_v16  ;;  %v546_v40 = vadd.f32 %v524_v8, %v503_v5  ;;  %v547_v42 = vadd.f32 %v520_v26, %v504_v20 }
 0x1cf   :  { %566 = vst [vmem:[#allocation8 + $0x38] sm:$0xff] %v534_v27  ;;  %567 = vst [vmem:[#allocation8 + $0x40] sm:$0xff] %v535_v33  ;;  %v548_v43 = vadd.f32 %v524_v8, %v505_v18  ;;  %v549_v45 = vadd.f32 %v520_v26, %v506_v24  ;;  %v550_v47 = vadd.f32 %v524_v8, %v507_v22 }
 0x1d0   :  { %568 = vst [vmem:[#allocation8 + $0x48] sm:$0xff] %v536_v31  ;;  %569 = vst [vmem:[#allocation8 + $0x50] sm:$0xff] %v537_v7  ;;  %v551_v51 = vadd.f32 %v520_v26, %v953_v28  ;;  %v552_v52 = vadd.f32 %v524_v8, %v509_v30  ;;  %v553_v53 = vadd.f32 %v520_v26, %v956_v34 }
 0x1d1   :  { %570 = vst [vmem:[#allocation8 + $0x58] sm:$0xff] %v538_v9  ;;  %571 = vst [vmem:[#allocation8 + $0x60] sm:$0xff] %v539_v46  ;;  %v554_v54 = vadd.f32 %v524_v8, %v511_v41  ;;  %v555_v55 = vadd.f32 %v520_v26, %v959_v49  ;;  %v556_v58 = vadd.f32 %v524_v8, %v513_v56 }
 0x1d2   :  { %572 = vst [vmem:[#allocation8 + $0x68] sm:$0xff] %v540_v11  ;;  %573 = vst [vmem:[#allocation8 + $0x70] sm:$0xff] %v541_v60  ;;  %v557_v59 = vadd.f32 %v520_v26, %v962_v13  ;;  %v558_v62 = vadd.f32 %v524_v8, %v515_v6 }
 0x1d3   :  { %574 = vst [vmem:[#allocation8 + $0x78] sm:$0xff] %v542_v50  ;;  %575 = vst [vmem:[#allocation8 + $0x80] sm:$0xff] %v543_v36 }
 0x1d4   :  { %576 = vst [vmem:[#allocation8 + $0x88] sm:$0xff] %v544_v37  ;;  %577 = vst [vmem:[#allocation8 + $0x90] sm:$0xff] %v545_v39 }
 0x1d5   :  { %578 = vst [vmem:[#allocation8 + $0x98] sm:$0xff] %v546_v40  ;;  %579 = vst [vmem:[#allocation8 + $0xa0] sm:$0xff] %v547_v42 }
 0x1d6   :  { %580 = vst [vmem:[#allocation8 + $0xa8] sm:$0xff] %v548_v43  ;;  %581 = vst [vmem:[#allocation8 + $0xb0] sm:$0xff] %v549_v45 }
 0x1d7   :  { %582 = vst [vmem:[#allocation8 + $0xb8] sm:$0xff] %v550_v47  ;;  %583 = vst [vmem:[#allocation8 + $0xc0] sm:$0xff] %v551_v51 }
 0x1d8   :  { %584 = vst [vmem:[#allocation8 + $0xc8] sm:$0xff] %v552_v52  ;;  %585 = vst [vmem:[#allocation8 + $0xd0] sm:$0xff] %v553_v53 }
 0x1d9   :  { %586 = vst [vmem:[#allocation8 + $0xd8] sm:$0xff] %v554_v54  ;;  %587 = vst [vmem:[#allocation8 + $0xe0] sm:$0xff] %v555_v55 }
 0x1da   :  { %588 = vst [vmem:[#allocation8 + $0xe8] sm:$0xff] %v556_v58  ;;  %589 = vst [vmem:[#allocation8 + $0xf0] sm:$0xff] %v557_v59 }
 0x1db   :  { %590 = vst [vmem:[#allocation8 + $0xf8] sm:$0xff] %v558_v62 }
 0x1dc   :  { %723 = shalt.err (!%p720_p5)
}
 0x1dd   :  { %602 = dma.vmem_to_hbm [thread:$0]  %s597_s2, 4096, %s993_s3, [#allocation4], %s740_s17, %s740_s17, %s741_s18  }
 0x1de   :  { %736 = dma.done.wait [#allocation4], 4096  }
 0x1df   :  { %737 = vsyncadd [#allocation4], 4294963200 }
 0x1e0   :  { %606 = vsyncpa [#allocation3], 1 }
 0x1e1   :  { %607 = vsyncpa [#allocation6], 1 }
 0x1e2   :  { %608 = vsyncpa [#allocation4], 1 }

// kernel: tpu_custom_call.1
= control target key start
LH: loop header
LB: loop body
LE: loop exit
PB: predicated region body
PF: predicated region fallthrough
CT: control target
= control target key end

     0   :  { %8 = vsyncpa [#allocation3], 0  ;;  %s990_s0 = inlined_call_operand.hbm [shape: f32[128,256], index: 0, kind: input, shape index: {}]   ;;  %s991_s1 = inlined_call_operand.hbm [shape: f32[256,256], index: 1, kind: input, shape index: {}]   ;;  %s992_s2 = inlined_call_operand.hbm [shape: f32[2,256], index: 2, kind: input, shape index: {}]   ;;  %s993_s3 = inlined_call_operand.hbm [shape: f32[128,256], index: 3, kind: output, shape index: {}]  }
   0x1   :  { %9 = vsyncpa [#allocation6], 0 }
   0x2   :  { %10 = vsyncpa [#allocation4], 0  ;;  %s738_s12 = smov [#allocation5]   ;;  %s739_s14 = smov [#allocation2]  }
   0x3   :  { %s28_s13 = sshll.u32 %s738_s12, 4  ;;  %s16_s15 = sshll.u32 %s739_s14, 4  ;;  %s29_s13 = int_to_ptr.vmem [resolvable:$true] %s28_s13  ;;  %s17_s15 = int_to_ptr.vmem [resolvable:$true] %s16_s15 }
   0x4   :  { %s660_s16 = scalar_lea.vmem %s29_s13, 8192  ;;  %p665_p1 = scmp.lt.s32.totalorder %s29_s13, %s29_s13 }
   0x5   :  { %p661_p0 = scmp.ne.s32.totalorder %s29_s13, %s660_s16  ;;  %p666_p2 = scmp.lt.s32.totalorder %s660_s16, %s660_s16 }
   0x7   :  { %p667_p3 = por %p666_p2, %p665_p1 }
   0x9   :  { %p668_p4 = pnand %p667_p3, %p661_p0 }
   0xb   :  { %671 = shalt.err (!%p668_p4)
}
   0xc   :  { %s740_s17 = smov 256   ;;  %s741_s18 = smov 16  }
   0xd   :  { %34 = dma.hbm_to_vmem [thread:$0]  %s991_s1, 8192, %s29_s13, [#allocation6], %s740_s17, %s740_s17, %s741_s18  }
   0xe   :  { %s680_s21 = scalar_lea.vmem %s17_s15, 4096  ;;  %p685_p6 = scmp.lt.s32.totalorder %s17_s15, %s17_s15 }
   0xf   :  { %p681_p5 = scmp.ne.s32.totalorder %s17_s15, %s680_s21  ;;  %p686_p7 = scmp.lt.s32.totalorder %s680_s21, %s680_s21 }
  0x11   :  { %p687_p8 = por %p686_p7, %p685_p6 }
  0x13   :  { %p688_p9 = pnand %p687_p8, %p681_p5 }
  0x15   :  { %691 = shalt.err (!%p688_p9)
}
  0x16   :  { %22 = dma.hbm_to_vmem [thread:$0]  %s990_s0, 4096, %s17_s15, [#allocation3], %s740_s17, %s740_s17, %s741_s18  }
  0x17   :  { %s742_s24 = smov [#allocation7]  }
  0x18   :  { %s41_s25 = sshll.u32 %s742_s24, 4  ;;  %s42_s25 = int_to_ptr.vmem [resolvable:$true] %s41_s25 }
  0x19   :  { %s700_s26 = scalar_lea.vmem %s42_s25, 64  ;;  %p705_p11 = scmp.lt.s32.totalorder %s42_s25, %s42_s25 }
  0x1a   :  { %p701_p10 = scmp.ne.s32.totalorder %s42_s25, %s700_s26  ;;  %p706_p12 = scmp.lt.s32.totalorder %s700_s26, %s700_s26 }
  0x1c   :  { %p707_p13 = por %p706_p12, %p705_p11 }
  0x1e   :  { %p708_p0 = pnand %p707_p13, %p701_p10 }
  0x20   :  { %711 = shalt.err (!%p708_p0)
}
  0x21   :  { %44 = dma.hbm_to_vmem [thread:$0]  %s992_s2, 64, %s42_s25, [#allocation6]  }
  0x22   :  { %732 = dma.done.wait [#allocation3], 4096  }
  0x23   :  { %733 = vsyncadd [#allocation3], 4294963200 }
  0x24   :  { %734 = dma.done.wait [#allocation6], 8256  }
  0x25   :  { %735 = vsyncadd [#allocation6], 4294959040  ;;  %v131_v0 = vld [vmem:[#allocation5 + $0xe8] sm:$0xff]  ;;  %v133_v1 = vld [vmem:[#allocation5 + $0xf8] sm:$0xff]  ;;  %s744_s0 = smov [#allocation8]  }
  0x26   :  { %v130_v2 = vld [vmem:[#allocation5 + $0xe0] sm:$0xff]  ;;  %v181_v3 = vpack.c.bf16 %v133_v1, %v131_v0  ;;  %v132_v4 = vld [vmem:[#allocation5 + $0xf0] sm:$0xff]  ;;  %v127_v5 = vld [vmem:[#allocation5 + $0xc8] sm:$0xff]  ;;  %s596_s2 = sshll.u32 %s744_s0, 4  ;;  %s597_s2 = int_to_ptr.vmem [resolvable:$true] %s596_s2 }
  0x27   :  { %v129_v6 = vld [vmem:[#allocation5 + $0xd8] sm:$0xff]  ;;  %v180_v7 = vpack.c.bf16 %v132_v4, %v130_v2  ;;  %v126_v9 = vld [vmem:[#allocation5 + $0xc0] sm:$0xff]  ;;  %v128_v10 = vld [vmem:[#allocation5 + $0xd0] sm:$0xff]  ;;  %s712_s28 = scalar_lea.vmem %s597_s2, 4096  ;;  %p717_p2 = scmp.lt.s32.totalorder %s597_s2, %s597_s2 }
  0x28   :  { %v179_v8 = vpack.c.bf16 %v129_v6, %v127_v5  ;;  %198 = vmatprep.subr.bf16.mxu0 %v181_v3  ;;  %609 = vmatprep.subr.bf16.mxu1 %v181_v3  ;;  %v123_v11 = vld [vmem:[#allocation5 + $0xa8] sm:$0xff]  ;;  %v125_v12 = vld [vmem:[#allocation5 + $0xb8] sm:$0xff]  ;;  %v178_v13 = vpack.c.bf16 %v128_v10, %v126_v9  ;;  %v122_v15 = vld [vmem:[#allocation5 + $0xa0] sm:$0xff]  ;;  %p713_p1 = scmp.ne.s32.totalorder %s597_s2, %s712_s28  ;;  %p718_p3 = scmp.lt.s32.totalorder %s712_s28, %s712_s28 }
  0x29   :  { %199 = vmatpush1.bf16.xpose.msra.mxu0 %v180_v7  ;;  %625 = vmatpush1.bf16.xpose.msra.mxu1 %v180_v7  ;;  %v177_v14 = vpack.c.bf16 %v125_v12, %v123_v11  ;;  %v124_v16 = vld [vmem:[#allocation5 + $0xb0] sm:$0xff]  ;;  %v119_v17 = vld [vmem:[#allocation5 + $0x88] sm:$0xff]  ;;  %v121_v18 = vld [vmem:[#allocation5 + $0x98] sm:$0xff] }
  0x2a   :  { %200 = vmatprep.subr.bf16.mxu0 %v179_v8  ;;  %610 = vmatprep.subr.bf16.mxu1 %v179_v8  ;;  %v176_v19 = vpack.c.bf16 %v124_v16, %v122_v15  ;;  %v175_v20 = vpack.c.bf16 %v121_v18, %v119_v17  ;;  %v118_v21 = vld [vmem:[#allocation5 + $0x80] sm:$0xff]  ;;  %v120_v22 = vld [vmem:[#allocation5 + $0x90] sm:$0xff]  ;;  %v55_v23 = vld [vmem:[#allocation2 + $0x8] sm:$0xff]  ;;  %p719_p4 = por %p718_p3, %p717_p2 }
  0x2b   :  { %v57_v24 = vld [vmem:[#allocation2 + $0x18] sm:$0xff]  ;;  %v115_v25 = vld [vmem:[#allocation5 + $0x68] sm:$0xff]  ;;  %v174_v28 = vpack.c.bf16 %v120_v22, %v118_v21  ;;  %v114_v33 = vld [vmem:[#allocation5 + $0x60] sm:$0xff] }
  0x2c   :  { %v117_v26 = vld [vmem:[#allocation5 + $0x78] sm:$0xff]  ;;  %v87_v27 = vpack.c.bf16 %v57_v24, %v55_v23  ;;  %v71_v29 = vld [vmem:[#allocation2 + $0x88] sm:$0xff]  ;;  %v116_v34 = vld [vmem:[#allocation5 + $0x70] sm:$0xff]  ;;  %p720_p5 = pnand %p719_p4, %p713_p1 }
  0x2d   :  { %v73_v30 = vld [vmem:[#allocation2 + $0x98] sm:$0xff]  ;;  %v173_v31 = vpack.c.bf16 %v117_v26, %v115_v25  ;;  %v111_v35 = vld [vmem:[#allocation5 + $0x48] sm:$0xff]  ;;  %v172_v37 = vpack.c.bf16 %v116_v34, %v114_v33  ;;  %v110_v39 = vld [vmem:[#allocation5 + $0x40] sm:$0xff] }
  0x2e   :  { %230 = vmatprep.mubr.bf16.mxu0 %v87_v27  ;;  %v95_v32 = vpack.c.bf16 %v73_v30, %v71_v29  ;;  %v113_v36 = vld [vmem:[#allocation5 + $0x58] sm:$0xff]  ;;  %v112_v40 = vld [vmem:[#allocation5 + $0x50] sm:$0xff]  ;;  %v107_v41 = vld [vmem:[#allocation5 + $0x28] sm:$0xff] }
  0x2f   :  { %v171_v38 = vpack.c.bf16 %v113_v36, %v111_v35  ;;  %v109_v42 = vld [vmem:[#allocation5 + $0x38] sm:$0xff]  ;;  %v170_v43 = vpack.c.bf16 %v112_v40, %v110_v39  ;;  %v106_v45 = vld [vmem:[#allocation5 + $0x20] sm:$0xff]  ;;  %v108_v46 = vld [vmem:[#allocation5 + $0x30] sm:$0xff] }
  0x30   :  { %270 = vmatprep.mubr.bf16.mxu1 %v95_v32  ;;  %v169_v44 = vpack.c.bf16 %v109_v42, %v107_v41  ;;  %v103_v47 = vld [vmem:[#allocation5 + $0x8] sm:$0xff]  ;;  %v105_v48 = vld [vmem:[#allocation5 + $0x18] sm:$0xff]  ;;  %v168_v49 = vpack.c.bf16 %v108_v46, %v106_v45  ;;  %v102_v51 = vld [vmem:[#allocation5] sm:$0xff] }
  0x31   :  { %201 = vmatpush1.bf16.xpose.msra.mxu0 %v178_v13  ;;  %626 = vmatpush1.bf16.xpose.msra.mxu1 %v178_v13  ;;  %v167_v50 = vpack.c.bf16 %v105_v48, %v103_v47  ;;  %v104_v52 = vld [vmem:[#allocation5 + $0x10] sm:$0xff]  ;;  %v163_v53 = vld [vmem:[#allocation5 + $0x1e8] sm:$0xff]  ;;  %v165_v54 = vld [vmem:[#allocation5 + $0x1f8] sm:$0xff] }
  0x32   :  { %202 = vmatprep.subr.bf16.mxu0 %v177_v14  ;;  %611 = vmatprep.subr.bf16.mxu1 %v177_v14  ;;  %v166_v55 = vpack.c.bf16 %v104_v52, %v102_v51  ;;  %v197_v56 = vpack.c.bf16 %v165_v54, %v163_v53  ;;  %v162_v57 = vld [vmem:[#allocation5 + $0x1e0] sm:$0xff]  ;;  %v164_v58 = vld [vmem:[#allocation5 + $0x1f0] sm:$0xff]  ;;  %v159_v59 = vld [vmem:[#allocation5 + $0x1c8] sm:$0xff] }
  0x33   :  { %v161_v60 = vld [vmem:[#allocation5 + $0x1d8] sm:$0xff]  ;;  %v196_v61 = vpack.c.bf16 %v164_v58, %v162_v57  ;;  %v158_v63 = vld [vmem:[#allocation5 + $0x1c0] sm:$0xff]  ;;  %v160_v0 = vld [vmem:[#allocation5 + $0x1d0] sm:$0xff] }
  0x34   :  { %v195_v62 = vpack.c.bf16 %v161_v60, %v159_v59  ;;  %v155_v1 = vld [vmem:[#allocation5 + $0x1a8] sm:$0xff]  ;;  %v157_v2 = vld [vmem:[#allocation5 + $0x1b8] sm:$0xff]  ;;  %v194_v3 = vpack.c.bf16 %v160_v0, %v158_v63  ;;  %v154_v5 = vld [vmem:[#allocation5 + $0x1a0] sm:$0xff] }
  0x35   :  { %v193_v4 = vpack.c.bf16 %v157_v2, %v155_v1  ;;  %v156_v6 = vld [vmem:[#allocation5 + $0x1b0] sm:$0xff]  ;;  %v151_v7 = vld [vmem:[#allocation5 + $0x188] sm:$0xff]  ;;  %v153_v8 = vld [vmem:[#allocation5 + $0x198] sm:$0xff] }
  0x36   :  { %v192_v9 = vpack.c.bf16 %v156_v6, %v154_v5  ;;  %v191_v10 = vpack.c.bf16 %v153_v8, %v151_v7  ;;  %v150_v11 = vld [vmem:[#allocation5 + $0x180] sm:$0xff]  ;;  %v152_v12 = vld [vmem:[#allocation5 + $0x190] sm:$0xff]  ;;  %v147_v13 = vld [vmem:[#allocation5 + $0x168] sm:$0xff] }
  0x37   :  { %v149_v14 = vld [vmem:[#allocation5 + $0x178] sm:$0xff]  ;;  %v190_v15 = vpack.c.bf16 %v152_v12, %v150_v11  ;;  %v146_v17 = vld [vmem:[#allocation5 + $0x160] sm:$0xff]  ;;  %v148_v18 = vld [vmem:[#allocation5 + $0x170] sm:$0xff] }
  0x38   :  { %v189_v16 = vpack.c.bf16 %v149_v14, %v147_v13  ;;  %v188_v21 = vpack.c.bf16 %v148_v18, %v146_v17  ;;  %v142_v23 = vld [vmem:[#allocation5 + $0x140] sm:$0xff]  ;;  %v144_v24 = vld [vmem:[#allocation5 + $0x150] sm:$0xff]  ;;  %v139_v25 = vld [vmem:[#allocation5 + $0x128] sm:$0xff] }
  0x39   :  { %203 = vmatpush1.bf16.xpose.msra.mxu0 %v176_v19  ;;  %627 = vmatpush1.bf16.xpose.msra.mxu1 %v176_v19  ;;  %v143_v19 = vld [vmem:[#allocation5 + $0x148] sm:$0xff]  ;;  %v141_v26 = vld [vmem:[#allocation5 + $0x138] sm:$0xff]  ;;  %v186_v27 = vpack.c.bf16 %v144_v24, %v142_v23  ;;  %v138_v29 = vld [vmem:[#allocation5 + $0x120] sm:$0xff] }
  0x3a   :  { %204 = vmatprep.subr.bf16.mxu0 %v175_v20  ;;  %612 = vmatprep.subr.bf16.mxu1 %v175_v20  ;;  %v145_v20 = vld [vmem:[#allocation5 + $0x158] sm:$0xff]  ;;  %v140_v30 = vld [vmem:[#allocation5 + $0x130] sm:$0xff]  ;;  %v134_v35 = vld [vmem:[#allocation5 + $0x100] sm:$0xff] }
  0x3b   :  { %v187_v22 = vpack.c.bf16 %v145_v20, %v143_v19  ;;  %v137_v32 = vld [vmem:[#allocation5 + $0x118] sm:$0xff]  ;;  %v184_v33 = vpack.c.bf16 %v140_v30, %v138_v29  ;;  %v136_v36 = vld [vmem:[#allocation5 + $0x110] sm:$0xff]  ;;  %v59_v40 = vld [vmem:[#allocation2 + $0x28] sm:$0xff] }
  0x3c   :  { %v56_v39 = vld [vmem:[#allocation2 + $0x10] sm:$0xff]  ;;  %v70_v41 = vld [vmem:[#allocation2 + $0x80] sm:$0xff]  ;;  %v77_v45 = vld [vmem:[#allocation2 + $0xb8] sm:$0xff] }
  0x3d   :  { %v72_v42 = vld [vmem:[#allocation2 + $0x90] sm:$0xff]  ;;  %v63_v52 = vld [vmem:[#allocation2 + $0x48] sm:$0xff]  ;;  %v74_v53 = vld [vmem:[#allocation2 + $0xa0] sm:$0xff] }
  0x3e   :  { %v94_v47 = vpack.c.bf16 %v72_v42, %v70_v41  ;;  %v60_v51 = vld [vmem:[#allocation2 + $0x30] sm:$0xff]  ;;  %v81_v57 = vld [vmem:[#allocation2 + $0xd8] sm:$0xff]  ;;  %v67_v0 = vld [vmem:[#allocation2 + $0x68] sm:$0xff] }
  0x3f   :  { %v76_v54 = vld [vmem:[#allocation2 + $0xb0] sm:$0xff]  ;;  %v78_v1 = vld [vmem:[#allocation2 + $0xc0] sm:$0xff]  ;;  %v85_v5 = vld [vmem:[#allocation2 + $0xf8] sm:$0xff] }
  0x40   :  { %v96_v59 = vpack.c.bf16 %v76_v54, %v74_v53  ;;  %v64_v63 = vld [vmem:[#allocation2 + $0x50] sm:$0xff]  ;;  %v82_v12 = vld [vmem:[#allocation2 + $0xe0] sm:$0xff] }
  0x41   :  { %205 = vmatpush1.bf16.xpose.msra.mxu0 %v174_v28  ;;  %628 = vmatpush1.bf16.xpose.msra.mxu1 %v174_v28  ;;  %v185_v28 = vpack.c.bf16 %v141_v26, %v139_v25  ;;  %v80_v2 = vld [vmem:[#allocation2 + $0xd0] sm:$0xff] }
  0x42   :  { %206 = vmatprep.subr.bf16.mxu0 %v173_v31  ;;  %613 = vmatprep.subr.bf16.mxu1 %v173_v31  ;;  %v135_v31 = vld [vmem:[#allocation5 + $0x108] sm:$0xff]  ;;  %v98_v7 = vpack.c.bf16 %v80_v2, %v78_v1  ;;  %v68_v11 = vld [vmem:[#allocation2 + $0x70] sm:$0xff] }
  0x43   :  { %v183_v34 = vpack.c.bf16 %v137_v32, %v135_v31  ;;  %v84_v13 = vld [vmem:[#allocation2 + $0xf0] sm:$0xff] }
  0x49   :  { %207 = vmatpush1.bf16.xpose.msra.mxu0 %v172_v37  ;;  %629 = vmatpush1.bf16.xpose.msra.mxu1 %v172_v37  ;;  %v182_v37 = vpack.c.bf16 %v136_v36, %v134_v35 }
  0x4a   :  { %208 = vmatprep.subr.bf16.mxu0 %v171_v38  ;;  %614 = vmatprep.subr.bf16.mxu1 %v171_v38  ;;  %v54_v38 = vld [vmem:[#allocation2] sm:$0xff] }
  0x4b   :  { %v86_v46 = vpack.c.bf16 %v56_v39, %v54_v38 }
  0x51   :  { %209 = vmatpush1.bf16.xpose.msra.mxu0 %v170_v43  ;;  %630 = vmatpush1.bf16.xpose.msra.mxu1 %v170_v43  ;;  %v61_v43 = vld [vmem:[#allocation2 + $0x38] sm:$0xff] }
  0x52   :  { %210 = vmatprep.subr.bf16.mxu0 %v169_v44  ;;  %615 = vmatprep.subr.bf16.mxu1 %v169_v44  ;;  %v75_v44 = vld [vmem:[#allocation2 + $0xa8] sm:$0xff]  ;;  %v89_v48 = vpack.c.bf16 %v61_v43, %v59_v40 }
  0x59   :  { %211 = vmatpush1.bf16.xpose.msra.mxu0 %v168_v49  ;;  %631 = vmatpush1.bf16.xpose.msra.mxu1 %v168_v49  ;;  %v97_v49 = vpack.c.bf16 %v77_v45, %v75_v44 }
  0x5a   :  { %212 = vmatprep.subr.bf16.mxu0 %v167_v50  ;;  %616 = vmatprep.subr.bf16.mxu1 %v167_v50  ;;  %v58_v50 = vld [vmem:[#allocation2 + $0x20] sm:$0xff] }
  0x5b   :  { %v88_v58 = vpack.c.bf16 %v60_v51, %v58_v50 }
  0x61   :  { %213 = vmatpush1.bf16.xpose.msra.mxu0 %v166_v55  ;;  %632 = vmatpush1.bf16.xpose.msra.mxu1 %v166_v55  ;;  %v65_v55 = vld [vmem:[#allocation2 + $0x58] sm:$0xff] }
  0x62   :  { %214 = vmatprep.subr.bf16.mxu0 %v197_v56  ;;  %617 = vmatprep.subr.bf16.mxu1 %v197_v56  ;;  %v79_v56 = vld [vmem:[#allocation2 + $0xc8] sm:$0xff]  ;;  %v91_v60 = vpack.c.bf16 %v65_v55, %v63_v52 }
  0x69   :  { %215 = vmatpush2.bf16.xpose.msra.mxu0 %v196_v61  ;;  %633 = vmatpush2.bf16.xpose.msra.mxu1 %v196_v61  ;;  %v99_v61 = vpack.c.bf16 %v81_v57, %v79_v56 }
  0x6a   :  { %216 = vmatprep.subr.bf16.mxu0 %v195_v62  ;;  %618 = vmatprep.subr.bf16.mxu1 %v195_v62  ;;  %v62_v62 = vld [vmem:[#allocation2 + $0x40] sm:$0xff] }
  0x6b   :  { %v90_v6 = vpack.c.bf16 %v64_v63, %v62_v62 }
  0x71   :  { %217 = vmatpush2.bf16.xpose.msra.mxu0 %v194_v3  ;;  %634 = vmatpush2.bf16.xpose.msra.mxu1 %v194_v3  ;;  %v69_v3 = vld [vmem:[#allocation2 + $0x78] sm:$0xff] }
  0x72   :  { %218 = vmatprep.subr.bf16.mxu0 %v193_v4  ;;  %619 = vmatprep.subr.bf16.mxu1 %v193_v4  ;;  %v83_v4 = vld [vmem:[#allocation2 + $0xe8] sm:$0xff]  ;;  %v93_v8 = vpack.c.bf16 %v69_v3, %v67_v0 }
  0x79   :  { %219 = vmatpush2.bf16.xpose.msra.mxu0 %v192_v9  ;;  %635 = vmatpush2.bf16.xpose.msra.mxu1 %v192_v9  ;;  %v101_v9 = vpack.c.bf16 %v85_v5, %v83_v4 }
  0x7a   :  { %220 = vmatprep.subr.bf16.mxu0 %v191_v10  ;;  %620 = vmatprep.subr.bf16.mxu1 %v191_v10  ;;  %v66_v10 = vld [vmem:[#allocation2 + $0x60] sm:$0xff] }
  0x7b   :  { %v92_v14 = vpack.c.bf16 %v68_v11, %v66_v10 }
  0x81   :  { %221 = vmatpush2.bf16.xpose.msra.mxu0 %v190_v15  ;;  %636 = vmatpush2.bf16.xpose.msra.mxu1 %v190_v15  ;;  %v100_v15 = vpack.c.bf16 %v84_v13, %v82_v12 }
  0x82   :  { %222 = vmatprep.subr.bf16.mxu0 %v189_v16  ;;  %621 = vmatprep.subr.bf16.mxu1 %v189_v16 }
  0x89   :  { %223 = vmatpush2.bf16.xpose.msra.mxu0 %v188_v21  ;;  %637 = vmatpush2.bf16.xpose.msra.mxu1 %v188_v21 }
  0x8a   :  { %224 = vmatprep.subr.bf16.mxu0 %v187_v22  ;;  %622 = vmatprep.subr.bf16.mxu1 %v187_v22 }
  0x91   :  { %225 = vmatpush2.bf16.xpose.msra.mxu0 %v186_v27  ;;  %638 = vmatpush2.bf16.xpose.msra.mxu1 %v186_v27 }
  0x92   :  { %226 = vmatprep.subr.bf16.mxu0 %v185_v28  ;;  %623 = vmatprep.subr.bf16.mxu1 %v185_v28 }
  0x99   :  { %227 = vmatpush2.bf16.xpose.msra.mxu0 %v184_v33  ;;  %639 = vmatpush2.bf16.xpose.msra.mxu1 %v184_v33 }
  0x9a   :  { %228 = vmatprep.subr.bf16.mxu0 %v183_v34  ;;  %624 = vmatprep.subr.bf16.mxu1 %v183_v34 }
  0xa1   :  { %229 = vmatpush2.bf16.xpose.msra.mxu0 %v182_v37  ;;  %640 = vmatpush2.bf16.xpose.msra.mxu1 %v182_v37 }
  0xa8   :  { %231 = vmatmul.mubr.bf16.vlgmr.msra.gmra.mxu0 %v86_v46  ;;  %271 = vmatmul.mubr.bf16.vlgmr.msra.gmra.mxu1 %v94_v47 }
  0xa9   :  { %240 = vmatprep.mubr.bf16.mxu0 %v89_v48  ;;  %280 = vmatprep.mubr.bf16.mxu1 %v97_v49 }
  0xb0   :  { %241 = vmatmul.mubr.bf16.gmra.mxu0 %v88_v58  ;;  %281 = vmatmul.mubr.bf16.gmra.mxu1 %v96_v59 }
  0xb1   :  { %250 = vmatprep.mubr.bf16.mxu0 %v91_v60  ;;  %290 = vmatprep.mubr.bf16.mxu1 %v99_v61 }
  0xb8   :  { %251 = vmatmul.mubr.bf16.gmra.mxu0 %v90_v6  ;;  %291 = vmatmul.mubr.bf16.gmra.mxu1 %v98_v7 }
  0xb9   :  { %260 = vmatprep.mubr.bf16.mxu0 %v93_v8  ;;  %300 = vmatprep.mubr.bf16.mxu1 %v101_v9 }
  0xc0   :  { %261 = vmatmul.mubr.bf16.gmra.mxu0 %v92_v14  ;;  %301 = vmatmul.mubr.bf16.gmra.mxu1 %v100_v15 }
 0x168   :  { %v780_v16 = vpop.f32.mrf.mxu0  ;;  %v782_v17 = vpop.f32.mrf.mxu1 }
 0x169   :  { %v355_v36 = vmul.f32 %v780_v16, %v780_v16 }
 0x16a   :  { %v784_v18 = vpop.f32.mrf.mxu0  ;;  %v786_v19 = vpop.f32.mrf.mxu1 }
 0x16b   :  { %v356_v39 = vmul.f32 %v784_v18, %v784_v18 }
 0x16c   :  { %v788_v20 = vpop.f32.mrf.mxu0  ;;  %v790_v21 = vpop.f32.mrf.mxu1 }
 0x16d   :  { %v357_v32 = vmul.f32 %v788_v20, %v788_v20  ;;  %v311_v37 = vadd.f32 %v788_v20, %v780_v16 }
 0x16e   :  { %v792_v22 = vpop.f32.mrf.mxu0  ;;  %v794_v23 = vpop.f32.mrf.mxu1 }
 0x16f   :  { %v358_v33 = vmul.f32 %v792_v22, %v792_v22  ;;  %v387_v42 = vadd.f32 %v357_v32, %v355_v36  ;;  %v332_v43 = vadd.f32 %v792_v22, %v784_v18  ;;  %v371_v36 = vmul.f32 %v782_v17, %v782_v17 }
 0x170   :  { %v796_v24 = vpop.f32.mrf.mxu0  ;;  %v798_v25 = vpop.f32.mrf.mxu1 }
 0x171   :  { %v359_v38 = vmul.f32 %v796_v24, %v796_v24  ;;  %v312_v44 = vadd.f32 %v311_v37, %v796_v24  ;;  %v408_v47 = vadd.f32 %v358_v33, %v356_v39 }
 0x172   :  { %v800_v26 = vpop.f32.mrf.mxu0  ;;  %v802_v27 = vpop.f32.mrf.mxu1 }
 0x173   :  { %v360_v40 = vmul.f32 %v800_v26, %v800_v26  ;;  %v388_v50 = vadd.f32 %v387_v42, %v359_v38  ;;  %v333_v51 = vadd.f32 %v332_v43, %v800_v26 }
 0x174   :  { %v804_v28 = vpop.f32.mrf.mxu0  ;;  %v806_v29 = vpop.f32.mrf.mxu1 }
 0x175   :  { %v361_v45 = vmul.f32 %v804_v28, %v804_v28  ;;  %v313_v52 = vadd.f32 %v312_v44, %v804_v28  ;;  %v409_v54 = vadd.f32 %v408_v47, %v360_v40  ;;  %v373_v47 = vmul.f32 %v790_v21, %v790_v21 }
 0x176   :  { %v808_v30 = vpop.f32.mrf.mxu0  ;;  %v810_v31 = vpop.f32.mrf.mxu1 }
 0x177   :  { %v362_v48 = vmul.f32 %v808_v30, %v808_v30  ;;  %v389_v57 = vadd.f32 %v388_v50, %v361_v45  ;;  %v334_v58 = vadd.f32 %v333_v51, %v808_v30  ;;  %v372_v45 = vmul.f32 %v786_v19, %v786_v19 }
 0x178   :  { %v816_v34 = vpop.f32.mrf.mxu0  ;;  %v818_v35 = vpop.f32.mrf.mxu1 }
 0x179   :  { %v363_v53 = vmul.f32 %v816_v34, %v816_v34  ;;  %v314_v59 = vadd.f32 %v313_v52, %v816_v34  ;;  %v410_v62 = vadd.f32 %v409_v54, %v362_v48  ;;  %v375_v54 = vmul.f32 %v798_v25, %v798_v25 }
 0x17a   :  { %v830_v41 = vpop.f32.mrf.mxu0  ;;  %v837_v46 = vpop.f32.mrf.mxu1 }
 0x17b   :  { %v364_v55 = vmul.f32 %v830_v41, %v830_v41  ;;  %v390_v1 = vadd.f32 %v389_v57, %v363_v53  ;;  %v335_v2 = vadd.f32 %v334_v58, %v830_v41  ;;  %v374_v53 = vmul.f32 %v794_v23, %v794_v23 }
 0x17c   :  { %v841_v49 = vpop.f32.mrf.mxu0  ;;  %v855_v61 = vpop.f32.mrf.mxu1 }
 0x17d   :  { %v365_v60 = vmul.f32 %v841_v49, %v841_v49  ;;  %v315_v3 = vadd.f32 %v314_v59, %v841_v49  ;;  %v411_v5 = vadd.f32 %v410_v62, %v364_v55  ;;  %v376_v62 = vmul.f32 %v802_v27, %v802_v27 }
 0x17e   :  { %v849_v56 = vpop.f32.mrf.mxu0  ;;  %v871_v11 = vpop.f32.mrf.mxu1 }
 0x17f   :  { %v366_v63 = vmul.f32 %v849_v56, %v849_v56  ;;  %v391_v7 = vadd.f32 %v390_v1, %v365_v60  ;;  %v336_v8 = vadd.f32 %v335_v2, %v849_v56 }
 0x180   :  { %v859_v0 = vpop.f32.mrf.mxu0  ;;  %v887_v44 = vpop.f32.mrf.mxu1 }
 0x181   :  { %v367_v4 = vmul.f32 %v859_v0, %v859_v0  ;;  %v316_v9 = vadd.f32 %v315_v3, %v859_v0  ;;  %v412_v12 = vadd.f32 %v411_v5, %v366_v63  ;;  %v377_v63 = vmul.f32 %v806_v29, %v806_v29 }
 0x182   :  { %v865_v6 = vpop.f32.mrf.mxu0  ;;  %v901_v60 = vpop.f32.mrf.mxu1  ;;  %v378_v5 = vmul.f32 %v810_v31, %v810_v31 }
 0x183   :  { %v368_v10 = vmul.f32 %v865_v6, %v865_v6  ;;  %v392_v14 = vadd.f32 %v391_v7, %v367_v4  ;;  %v337_v15 = vadd.f32 %v336_v8, %v865_v6  ;;  %v379_v7 = vmul.f32 %v818_v35, %v818_v35 }
 0x184   :  { %v873_v13 = vpop.f32.mrf.mxu0 }
 0x185   :  { %v317_v32 = vadd.f32 %v316_v9, %v873_v13  ;;  %v369_v33 = vmul.f32 %v873_v13, %v873_v13  ;;  %v413_v37 = vadd.f32 %v412_v12, %v368_v10 }
 0x186   :  { %v881_v38 = vpop.f32.mrf.mxu0 }
 0x187   :  { %v318_v39 = vadd.f32 %v317_v32, %v782_v17  ;;  %v393_v40 = vadd.f32 %v392_v14, %v369_v33  ;;  %v338_v42 = vadd.f32 %v337_v15, %v881_v38  ;;  %v370_v43 = vmul.f32 %v881_v38, %v881_v38  ;;  %v915_v14 = vpop.f32.mrf.mxu1 }
 0x188   :  { %v380_v15 = vmul.f32 %v837_v46, %v837_v46  ;;  %v381_v32 = vmul.f32 %v855_v61, %v855_v61 }
 0x189   :  { %v319_v48 = vadd.f32 %v318_v39, %v790_v21  ;;  %v394_v50 = vadd.f32 %v393_v40, %v371_v36  ;;  %v339_v51 = vadd.f32 %v338_v42, %v786_v19  ;;  %v414_v52 = vadd.f32 %v413_v37, %v370_v43 }
 0x18a   :  { %v382_v40 = vmul.f32 %v871_v11, %v871_v11  ;;  %v383_v42 = vmul.f32 %v887_v44, %v887_v44 }
 0x18b   :  { %v395_v55 = vadd.f32 %v394_v50, %v373_v47  ;;  %v340_v57 = vadd.f32 %v339_v51, %v794_v23  ;;  %v415_v58 = vadd.f32 %v414_v52, %v372_v45  ;;  %v320_v59 = vadd.f32 %v319_v48, %v798_v25  ;;  %v929_v50 = vpop.f32.mrf.mxu1 }
 0x18c   :  { %v384_v51 = vmul.f32 %v901_v60, %v901_v60  ;;  %v385_v52 = vmul.f32 %v915_v14, %v915_v14 }
 0x18d   :  { %v341_v1 = vadd.f32 %v340_v57, %v802_v27  ;;  %v416_v2 = vadd.f32 %v415_v58, %v374_v53  ;;  %v321_v3 = vadd.f32 %v320_v59, %v806_v29  ;;  %v396_v4 = vadd.f32 %v395_v55, %v375_v54 }
 0x18e   :  { %v386_v58 = vmul.f32 %v929_v50, %v929_v50 }
 0x18f   :  { %v417_v8 = vadd.f32 %v416_v2, %v376_v62  ;;  %v322_v9 = vadd.f32 %v321_v3, %v818_v35  ;;  %v397_v10 = vadd.f32 %v396_v4, %v377_v63  ;;  %v342_v12 = vadd.f32 %v341_v1, %v810_v31 }
 0x191   :  { %v323_v33 = vadd.f32 %v322_v9, %v855_v61  ;;  %v398_v36 = vadd.f32 %v397_v10, %v379_v7  ;;  %v343_v37 = vadd.f32 %v342_v12, %v837_v46  ;;  %v418_v39 = vadd.f32 %v417_v8, %v378_v5 }
 0x193   :  { %v399_v43 = vadd.f32 %v398_v36, %v381_v32  ;;  %v344_v45 = vadd.f32 %v343_v37, %v871_v11  ;;  %v419_v47 = vadd.f32 %v418_v39, %v380_v15  ;;  %v324_v48 = vadd.f32 %v323_v33, %v887_v44 }
 0x195   :  { %v420_v53 = vadd.f32 %v419_v47, %v382_v40  ;;  %v400_v54 = vadd.f32 %v399_v43, %v383_v42  ;;  %v345_v55 = vadd.f32 %v344_v45, %v901_v60  ;;  %v325_v57 = vadd.f32 %v324_v48, %v915_v14 }
 0x197   :  { %v421_v59 = vadd.f32 %v420_v53, %v384_v51  ;;  %v326_v62 = vrot.slane %v325_v57, 4  ;;  %v401_v63 = vadd.f32 %v400_v54, %v385_v52  ;;  %v346_v1 = vadd.f32 %v345_v55, %v929_v50 }
 0x199   :  { %v327_v2 = vadd.f32 %v326_v62, %v325_v57  ;;  %v402_v3 = vrot.slane %v401_v63, 4  ;;  %v347_v4 = vrot.slane %v346_v1, 4  ;;  %v422_v5 = vadd.f32 %v421_v59, %v386_v58 }
 0x19b   :  { %v328_v7 = vrot.slane %v327_v2, 2  ;;  %v403_v8 = vadd.f32 %v402_v3, %v401_v63  ;;  %v348_v9 = vadd.f32 %v347_v4, %v346_v1  ;;  %v423_v10 = vrot.slane %v422_v5, 4 }
 0x19c   :  { %v443_v3 = vlaneseq }
 0x19d   :  { %v329_v12 = vadd.f32 %v328_v7, %v327_v2  ;;  %v404_v15 = vrot.slane %v403_v8, 2  ;;  %v349_v32 = vrot.slane %v348_v9, 2  ;;  %v424_v33 = vadd.f32 %v423_v10, %v422_v5 }
 0x19e   :  { %v444_v5 = vshrl.u32 %v443_v3, 7 }
 0x19f   :  { %v330_v36 = vrot.slane %v329_v12, 1  ;;  %v405_v37 = vadd.f32 %v404_v15, %v403_v8  ;;  %v350_v39 = vadd.f32 %v349_v32, %v348_v9  ;;  %v425_v40 = vrot.slane %v424_v33, 2  ;;  %v439_v8 = vld [vmem:[#allocation7] ss:$2 sm:$0x3] }
 0x1a0   :  { %v445_v7 = vsub.s32 0, %v444_v5  ;;  %v449_v9 = vsub.s32 1, %v444_v5  ;;  %v743_v32 = vmov 1966171168  }
 0x1a1   :  { %v331_v42 = vadd.f32 %v330_v36, %v329_v12  ;;  %v406_v43 = vrot.slane %v405_v37, 1  ;;  %v351_v45 = vrot.slane %v350_v39, 1  ;;  %v426_v47 = vadd.f32 %v425_v40, %v424_v33 }
 0x1a2   :  { %v446_v10 = vrot.slane %v439_v8, %v445_v7  ;;  %v450_v15 = vrot.slane %v439_v8, %v449_v9  ;;  %v461_v33 = vunpack.c.l.s4 %v743_v32 }
 0x1a3   :  { %v353_v48 = vmul.f32 0.0078125, %v331_v42  ;;  %v407_v51 = vadd.f32 %v406_v43, %v405_v37  ;;  %v352_v52 = vadd.f32 %v351_v45, %v350_v39  ;;  %v427_v53 = vrot.slane %v426_v47, 1 }
 0x1a4   :  { %v462_v40 = vunpack.c.0.s8 %v461_v33 }
 0x1a5   :  { %v429_v54 = vmul.f32 0.0078125, %v407_v51  ;;  %v431_v55 = vmul.f32 %v353_v48, %v353_v48  ;;  %v354_v57 = vmul.f32 0.0078125, %v352_v52  ;;  %v428_v58 = vadd.f32 %v427_v53, %v426_v47 }
 0x1a6   :  { %v465_v47 = vsub.s32 %v462_v40, %v444_v5 }
 0x1a7   :  { %v433_v59 = vsub.f32 %v429_v54, %v431_v55  ;;  %v430_v62 = vmul.f32 0.0078125, %v428_v58  ;;  %v432_v63 = vmul.f32 %v354_v57, %v354_v57 }
 0x1a9   :  { %v435_v1 = vadd.f32 1e-05, %v433_v59  ;;  %v434_v2 = vsub.f32 %v430_v62, %v432_v63 }
 0x1ab   :  { %648 = vrsqrt.f32 %v435_v1  ;;  %v436_v4 = vadd.f32 1e-05, %v434_v2  ;;  %v441_v2 = vld [vmem:[#allocation7 + $0x1] ss:$2 sm:$0x3] }
 0x1ad   :  { %650 = vrsqrt.f32 %v436_v4 }
 0x1b8   :  { %v649_v12 = vpop.eup %648 }
 0x1b9   :  { %v453_v37 = vmul.f32 %v649_v12, %v446_v10 }
 0x1ba   :  { %v651_v36 = vpop.eup %650 }
 0x1bb   :  { %v454_v39 = vmul.f32 %v651_v36, %v450_v15  ;;  %v479_v42 = vrot.slane %v453_v37, %v445_v7  ;;  %v455_v43 = vmul.f32 %v453_v37, %v353_v48 }
 0x1bd   :  { %v456_v45 = vmul.f32 %v454_v39, %v354_v57  ;;  %v484_v51 = vmul.f32 %v479_v42, %v780_v16  ;;  %v486_v52 = vmul.f32 %v479_v42, %v788_v20  ;;  %v488_v54 = vmul.f32 %v479_v42, %v796_v24 }
 0x1be   :  { %v490_v55 = vmul.f32 %v479_v42, %v804_v28  ;;  %v492_v58 = vmul.f32 %v479_v42, %v816_v34  ;;  %v483_v59 = vrot.slane %v454_v39, %v445_v7  ;;  %v494_v62 = vmul.f32 %v479_v42, %v841_v49 }
 0x1bf   :  { %v459_v53 = vcombine.low %v455_v43, %v456_v45  ;;  %v496_v63 = vmul.f32 %v479_v42, %v859_v0  ;;  %v498_v48 = vmul.f32 %v479_v42, %v873_v13  ;;  %v500_v1 = vmul.f32 %v479_v42, %v782_v17 }
 0x1c0   :  { %v502_v16 = vmul.f32 %v479_v42, %v790_v21  ;;  %v504_v20 = vmul.f32 %v479_v42, %v798_v25  ;;  %v506_v24 = vmul.f32 %v479_v42, %v806_v29  ;;  %v953_v28 = vmul.f32 %v479_v42, %v818_v35 }
 0x1c1   :  { %v466_v57 = vrot.slane %v459_v53, %v465_v47  ;;  %v956_v34 = vmul.f32 %v479_v42, %v855_v61  ;;  %v959_v49 = vmul.f32 %v479_v42, %v887_v44  ;;  %v962_v13 = vmul.f32 %v479_v42, %v915_v14 }
 0x1c2   :  { %v485_v17 = vmul.f32 %v483_v59, %v784_v18  ;;  %v487_v21 = vmul.f32 %v483_v59, %v792_v22  ;;  %v489_v25 = vmul.f32 %v483_v59, %v800_v26  ;;  %v491_v35 = vmul.f32 %v483_v59, %v808_v30 }
 0x1c3   :  { %v473_v0 = vrot.slane %v466_v57, %v465_v47  ;;  %v493_v3 = vmul.f32 %v483_v59, %v830_v41  ;;  %v495_v61 = vmul.f32 %v483_v59, %v849_v56  ;;  %v497_v44 = vmul.f32 %v483_v59, %v865_v6 }
 0x1c4   :  { %v499_v4 = vmul.f32 %v483_v59, %v881_v38  ;;  %v501_v14 = vmul.f32 %v483_v59, %v786_v19  ;;  %v503_v5 = vmul.f32 %v483_v59, %v794_v23  ;;  %v505_v18 = vmul.f32 %v483_v59, %v802_v27 }
 0x1c5   :  { %v475_v29 = vsub.f32 %v441_v2, %v473_v0  ;;  %v507_v22 = vmul.f32 %v483_v59, %v810_v31  ;;  %v509_v30 = vmul.f32 %v483_v59, %v837_v46  ;;  %v511_v41 = vmul.f32 %v483_v59, %v871_v11 }
 0x1c6   :  { %v513_v56 = vmul.f32 %v483_v59, %v901_v60  ;;  %v515_v6 = vmul.f32 %v483_v59, %v929_v50 }
 0x1c7   :  { %v520_v26 = vrot.slane %v475_v29, %v445_v7  ;;  %v524_v8 = vrot.slane %v475_v29, %v449_v9 }
 0x1c9   :  { %v527_v10 = vadd.f32 %v520_v26, %v484_v51  ;;  %v528_v38 = vadd.f32 %v524_v8, %v485_v17  ;;  %v529_v12 = vadd.f32 %v520_v26, %v486_v52  ;;  %v530_v19 = vadd.f32 %v524_v8, %v487_v21 }
 0x1ca   :  { %v531_v15 = vadd.f32 %v520_v26, %v488_v54  ;;  %v532_v23 = vadd.f32 %v524_v8, %v489_v25  ;;  %v533_v32 = vadd.f32 %v520_v26, %v490_v55  ;;  %v534_v27 = vadd.f32 %v524_v8, %v491_v35 }
 0x1cb   :  { %v535_v33 = vadd.f32 %v520_v26, %v492_v58  ;;  %v536_v31 = vadd.f32 %v524_v8, %v493_v3  ;;  %v537_v7 = vadd.f32 %v520_v26, %v494_v62  ;;  %v538_v9 = vadd.f32 %v524_v8, %v495_v61  ;;  %559 = vst [vmem:[#allocation8] sm:$0xff] %v527_v10 }
 0x1cc   :  { %560 = vst [vmem:[#allocation8 + $0x8] sm:$0xff] %v528_v38  ;;  %561 = vst [vmem:[#allocation8 + $0x10] sm:$0xff] %v529_v12  ;;  %v539_v46 = vadd.f32 %v520_v26, %v496_v63  ;;  %v540_v11 = vadd.f32 %v524_v8, %v497_v44  ;;  %v541_v60 = vadd.f32 %v520_v26, %v498_v48 }
 0x1cd   :  { %562 = vst [vmem:[#allocation8 + $0x18] sm:$0xff] %v530_v19  ;;  %v542_v50 = vadd.f32 %v524_v8, %v499_v4  ;;  %563 = vst [vmem:[#allocation8 + $0x20] sm:$0xff] %v531_v15  ;;  %v543_v36 = vadd.f32 %v520_v26, %v500_v1  ;;  %v544_v37 = vadd.f32 %v524_v8, %v501_v14 }
 0x1ce   :  { %564 = vst [vmem:[#allocation8 + $0x28] sm:$0xff] %v532_v23  ;;  %565 = vst [vmem:[#allocation8 + $0x30] sm:$0xff] %v533_v32  ;;  %v545_v39 = vadd.f32 %v520_v26, %v502_v16  ;;  %v546_v40 = vadd.f32 %v524_v8, %v503_v5  ;;  %v547_v42 = vadd.f32 %v520_v26, %v504_v20 }
 0x1cf   :  { %566 = vst [vmem:[#allocation8 + $0x38] sm:$0xff] %v534_v27  ;;  %567 = vst [vmem:[#allocation8 + $0x40] sm:$0xff] %v535_v33  ;;  %v548_v43 = vadd.f32 %v524_v8, %v505_v18  ;;  %v549_v45 = vadd.f32 %v520_v26, %v506_v24  ;;  %v550_v47 = vadd.f32 %v524_v8, %v507_v22 }
 0x1d0   :  { %568 = vst [vmem:[#allocation8 + $0x48] sm:$0xff] %v536_v31  ;;  %569 = vst [vmem:[#allocation8 + $0x50] sm:$0xff] %v537_v7  ;;  %v551_v51 = vadd.f32 %v520_v26, %v953_v28  ;;  %v552_v52 = vadd.f32 %v524_v8, %v509_v30  ;;  %v553_v53 = vadd.f32 %v520_v26, %v956_v34 }
 0x1d1   :  { %570 = vst [vmem:[#allocation8 + $0x58] sm:$0xff] %v538_v9  ;;  %571 = vst [vmem:[#allocation8 + $0x60] sm:$0xff] %v539_v46  ;;  %v554_v54 = vadd.f32 %v524_v8, %v511_v41  ;;  %v555_v55 = vadd.f32 %v520_v26, %v959_v49  ;;  %v556_v58 = vadd.f32 %v524_v8, %v513_v56 }
 0x1d2   :  { %572 = vst [vmem:[#allocation8 + $0x68] sm:$0xff] %v540_v11  ;;  %573 = vst [vmem:[#allocation8 + $0x70] sm:$0xff] %v541_v60  ;;  %v557_v59 = vadd.f32 %v520_v26, %v962_v13  ;;  %v558_v62 = vadd.f32 %v524_v8, %v515_v6 }
 0x1d3   :  { %574 = vst [vmem:[#allocation8 + $0x78] sm:$0xff] %v542_v50  ;;  %575 = vst [vmem:[#allocation8 + $0x80] sm:$0xff] %v543_v36 }
 0x1d4   :  { %576 = vst [vmem:[#allocation8 + $0x88] sm:$0xff] %v544_v37  ;;  %577 = vst [vmem:[#allocation8 + $0x90] sm:$0xff] %v545_v39 }
 0x1d5   :  { %578 = vst [vmem:[#allocation8 + $0x98] sm:$0xff] %v546_v40  ;;  %579 = vst [vmem:[#allocation8 + $0xa0] sm:$0xff] %v547_v42 }
 0x1d6   :  { %580 = vst [vmem:[#allocation8 + $0xa8] sm:$0xff] %v548_v43  ;;  %581 = vst [vmem:[#allocation8 + $0xb0] sm:$0xff] %v549_v45 }
 0x1d7   :  { %582 = vst [vmem:[#allocation8 + $0xb8] sm:$0xff] %v550_v47  ;;  %583 = vst [vmem:[#allocation8 + $0xc0] sm:$0xff] %v551_v51 }
 0x1d8   :  { %584 = vst [vmem:[#allocation8 + $0xc8] sm:$0xff] %v552_v52  ;;  %585 = vst [vmem:[#allocation8 + $0xd0] sm:$0xff] %v553_v53 }
 0x1d9   :  { %586 = vst [vmem:[#allocation8 + $0xd8] sm:$0xff] %v554_v54  ;;  %587 = vst [vmem:[#allocation8 + $0xe0] sm:$0xff] %v555_v55 }
 0x1da   :  { %588 = vst [vmem:[#allocation8 + $0xe8] sm:$0xff] %v556_v58  ;;  %589 = vst [vmem:[#allocation8 + $0xf0] sm:$0xff] %v557_v59 }
 0x1db   :  { %590 = vst [vmem:[#allocation8 + $0xf8] sm:$0xff] %v558_v62 }
 0x1dc   :  { %723 = shalt.err (!%p720_p5)
}
 0x1dd   :  { %602 = dma.vmem_to_hbm [thread:$0]  %s597_s2, 4096, %s993_s3, [#allocation4], %s740_s17, %s740_s17, %s741_s18  }
 0x1de   :  { %736 = dma.done.wait [#allocation4], 4096  }
 0x1df   :  { %737 = vsyncadd [#allocation4], 4294963200 }
 0x1e0   :  { %606 = vsyncpa [#allocation3], 1 }
 0x1e1   :  { %607 = vsyncpa [#allocation6], 1 }
 0x1e2   :  { %608 = vsyncpa [#allocation4], 1 }

</bundles_post_ra>
